<compile_context>
chip_gen: v5e
topology: v5e:2x2
jax: 0.10.0
libtpu: 0.0.40
codegen_flags: <defaults>
</compile_context>

<pallas_src>
import jax
import jax.numpy as jnp
from jax.experimental import pallas as pl
from jax.experimental.pallas import tpu as pltpu

INPUT_DIM = 4096
H1, H2 = 256, 128
NUM_CLASSES = 40
OUT_PAD = 128           # lane-dense padded output width
BN_EPS = 1e-5


def _default_k_tile():
    """Pick the layer-1 contraction tile per chip generation.

    v7x: grid=1 (whole w1 resident) — per-step overhead dominates the ~0.08 us DMA.
    v5e/v6e: 2 steps so the second w1 chunk's DMA hides the first chunk's matmul.
    """
    try:
        kind = jax.devices()[0].device_kind.lower()
        if "v7" in kind:
            return INPUT_DIM          # grid = 1
    except Exception:
        pass
    return 2048                       # grid = 2


def _mlp_bn_kernel(x_ref, w1_ref, w2_ref, w3_ref, vec_ref, o_ref, acc_ref):
    k = pl.program_id(0)

    @pl.when(k == 0)
    def _():
        acc_ref[...] = jnp.zeros_like(acc_ref)

    # Layer-1 partial matmul: bf16 operands (x arrives in bf16), f32 MXU accumulation.
    acc_ref[...] += jnp.dot(x_ref[...], w1_ref[...],
                            preferred_element_type=jnp.float32)

    @pl.when(k == pl.num_programs(0) - 1)
    def _():
        # ---- BatchNorm1d(256) + ReLU (training mode, biased variance). ----
        # Linear bias b1 is algebraically dead: (h+b) - mean(h+b) == h - mean(h).
        h = acc_ref[...]                                            # (B, 256) f32
        mean = jnp.mean(h, axis=0, keepdims=True)
        var = jnp.maximum(jnp.mean(h * h, axis=0, keepdims=True) - mean * mean, 0.0)
        scale = vec_ref[0:1, :H1] * jax.lax.rsqrt(var + BN_EPS)     # gamma1 folded in
        shift = vec_ref[1:2, :H1] - mean * scale                    # beta1 folded in
        h = jnp.maximum(h * scale + shift, 0.0)

        # ---- Linear(256,128) -> BatchNorm1d(128) -> ReLU (b2 dead as well). ----
        h = jnp.dot(h.astype(jnp.bfloat16), w2_ref[...],
                    preferred_element_type=jnp.float32)             # (B, 128) f32
        mean = jnp.mean(h, axis=0, keepdims=True)
        var = jnp.maximum(jnp.mean(h * h, axis=0, keepdims=True) - mean * mean, 0.0)
        scale = vec_ref[2:3, :H2] * jax.lax.rsqrt(var + BN_EPS)     # gamma2 folded in
        shift = vec_ref[3:4, :H2] - mean * scale                    # beta2 folded in
        h = jnp.maximum(h * scale + shift, 0.0)

        # ---- Output head: Linear(128, 40), padded to 128 lane-dense columns. ----
        out = jnp.dot(h.astype(jnp.bfloat16), w3_ref[...],
                      preferred_element_type=jnp.float32)           # (B, 128) f32
        o_ref[...] = (out + vec_ref[4:5, :OUT_PAD]).astype(o_ref.dtype)


def base_model_forward(x_bf16, kparams, k_tile=None):
    """x_bf16: (B, 4096) bfloat16 (produced upstream in bf16).
    kparams: packed kernel operands (see prepare_params)."""
    B = x_bf16.shape[0]
    if k_tile is None:
        k_tile = _default_k_tile()
    n_k = INPUT_DIM // k_tile

    flops = 2 * B * (INPUT_DIM * H1 + H1 * H2 + H2 * OUT_PAD)
    bytes_accessed = (x_bf16.size * 2
                      + kparams["w1"].size * 2 + kparams["w2"].size * 2
                      + kparams["w3p"].size * 2 + kparams["vec"].size * 4
                      + B * OUT_PAD * 4)

    out_padded = pl.pallas_call(
        _mlp_bn_kernel,
        out_shape=jax.ShapeDtypeStruct((B, OUT_PAD), jnp.float32),
        grid=(n_k,),
        in_specs=[
            pl.BlockSpec((B, k_tile), lambda k: (0, k)),        # x chunk (bf16)
            pl.BlockSpec((k_tile, H1), lambda k: (k, 0)),       # w1 chunk (bf16)
            pl.BlockSpec((H1, H2), lambda k: (0, 0)),           # w2 (bf16, resident)
            pl.BlockSpec((H2, OUT_PAD), lambda k: (0, 0)),      # w3 padded (bf16)
            pl.BlockSpec((8, H1), lambda k: (0, 0)),            # packed BN/bias vectors
        ],
        out_specs=pl.BlockSpec((B, OUT_PAD), lambda k: (0, 0)),
        scratch_shapes=[pltpu.VMEM((B, H1), jnp.float32)],      # layer-1 accumulator
        compiler_params=pltpu.CompilerParams(
            dimension_semantics=("arbitrary",)),
        cost_estimate=pl.CostEstimate(flops=flops, transcendentals=0,
                                      bytes_accessed=bytes_accessed),
    )(x_bf16, kparams["w1"], kparams["w2"], kparams["w3p"], kparams["vec"])

    return out_padded[:, :NUM_CLASSES]


def init_params(key):
    """PyTorch-style f32 parameters: nn.Linear default U[-1/sqrt(fan_in), +], BN affine."""
    dims = [INPUT_DIM, H1, H2, NUM_CLASSES]
    raw = {}
    keys = jax.random.split(key, 2 * (len(dims) - 1))
    for i in range(len(dims) - 1):
        fan_in, fan_out = dims[i], dims[i + 1]
        bound = 1.0 / (fan_in ** 0.5)
        # stored as (in, out) so x @ W is equivalent to PyTorch's x @ W.T
        raw[f"w{i+1}"] = jax.random.uniform(
            keys[2 * i], (fan_in, fan_out), jnp.float32, -bound, bound)
        raw[f"b{i+1}"] = jax.random.uniform(
            keys[2 * i + 1], (fan_out,), jnp.float32, -bound, bound)
    for i, dim in enumerate((H1, H2), start=1):
        raw[f"g{i}"] = jnp.ones((dim,), jnp.float32)    # BN weight (gamma)
        raw[f"be{i}"] = jnp.zeros((dim,), jnp.float32)  # BN bias  (beta)
    return raw


def prepare_params(raw):
    """Pack / cast parameters into the kernel's operand layout.

    b1, b2 are omitted: a per-feature bias added right before training-mode BN
    cancels exactly against the batch-mean subtraction (zero numerical change).
    """
    w1 = raw["w1"].astype(jnp.bfloat16)
    w2 = raw["w2"].astype(jnp.bfloat16)
    w3p = jnp.zeros((H2, OUT_PAD), jnp.float32)
    w3p = w3p.at[:, :NUM_CLASSES].set(raw["w3"]).astype(jnp.bfloat16)

    vec = jnp.zeros((8, H1), jnp.float32)
    vec = vec.at[0, :H1].set(raw["g1"])
    vec = vec.at[1, :H1].set(raw["be1"])
    vec = vec.at[2, :H2].set(raw["g2"])
    vec = vec.at[3, :H2].set(raw["be2"])
    vec = vec.at[4, :NUM_CLASSES].set(raw["b3"])
    return {"w1": w1, "w2": w2, "w3p": w3p, "vec": vec}


def base_model_reference(x, raw):
    """Pure-JAX f32 reference with the exact PyTorch forward semantics."""
    def bn(h, g, b):
        mean = jnp.mean(h, axis=0, keepdims=True)
        var = jnp.mean((h - mean) ** 2, axis=0, keepdims=True)   # biased variance
        return (h - mean) * jax.lax.rsqrt(var + BN_EPS) * g + b

    h = x @ raw["w1"] + raw["b1"]
    h = jnp.maximum(bn(h, raw["g1"], raw["be1"]), 0.0)
    h = h @ raw["w2"] + raw["b2"]
    h = jnp.maximum(bn(h, raw["g2"], raw["be2"]), 0.0)
    return h @ raw["w3"] + raw["b3"]


if __name__ == "__main__":
    key = jax.random.PRNGKey(0)
    pkey, xkey = jax.random.split(key)
    raw = init_params(pkey)
    kparams = prepare_params(raw)

    # small batch of flattened 64x64 "faces" (BatchNorm needs B >= 2; multiple of 8)
    B = 8
    x = jax.random.normal(xkey, (B, INPUT_DIM), jnp.float32)
    # x produced "upstream" in bf16 (no in-kernel cast, no extra wrapper round trip
    # inside the hot path).
    x_bf16 = x.astype(jnp.bfloat16)

    out = base_model_forward(x_bf16, kparams)
    out = jax.block_until_ready(out)
    assert out.shape == (B, NUM_CLASSES) and out.dtype == jnp.float32

    ref = base_model_reference(x, raw)
    assert bool(jnp.all(jnp.isfinite(out)))
    assert bool(jnp.allclose(out, ref, atol=5e-2, rtol=5e-2)), (
        "kernel/reference mismatch: max abs diff "
        f"{float(jnp.max(jnp.abs(out - ref)))}")
    print("KERNEL_OK")
</pallas_src>

<mosaic_0001>
module attributes {stable_mosaic.version = 11 : i64} {
  func.func @_mlp_bn_kernel(%arg0: i32, %arg1: memref<8x2048xbf16, #tpu.memory_space<vmem>>, %arg2: memref<2048x256xbf16, #tpu.memory_space<vmem>>, %arg3: memref<256x128xbf16, #tpu.memory_space<vmem>>, %arg4: memref<128x128xbf16, #tpu.memory_space<vmem>>, %arg5: memref<8x256xf32, #tpu.memory_space<vmem>>, %arg6: memref<8x128xf32, #tpu.memory_space<vmem>>, %arg7: memref<8x256xf32, #tpu.memory_space<vmem>>) attributes {dimension_semantics = [#tpu.dimension_semantics<arbitrary>], iteration_bounds = array<i64: 2>, scalar_prefetch = 0 : i64, scratch_operands = 1 : i64, tpu.core_type = #tpu.core_type<tc>, window_params = [{transform_indices = @transform_0, window_bounds = array<i64: 8, 2048>}, {transform_indices = @transform_1, window_bounds = array<i64: 2048, 256>}, {pipeline_mode = #tpu.pipeline_mode<synchronous>, transform_indices = @transform_2, window_bounds = array<i64: 256, 128>}, {pipeline_mode = #tpu.pipeline_mode<synchronous>, transform_indices = @transform_3, window_bounds = array<i64: 128, 128>}, {pipeline_mode = #tpu.pipeline_mode<synchronous>, transform_indices = @transform_4, window_bounds = array<i64: 8, 256>}, {pipeline_mode = #tpu.pipeline_mode<synchronous>, transform_indices = @transform_5, window_bounds = array<i64: 8, 128>}]} {
    %c0_i32 = arith.constant 0 : i32
    %0 = arith.cmpi eq, %arg0, %c0_i32 : i32
    %1 = arith.extui %0 : i1 to i32
    %c0_i32_0 = arith.constant 0 : i32
    %2 = arith.cmpi ne, %1, %c0_i32_0 : i32
    scf.if %2 {
      %cst_9 = arith.constant 0.000000e+00 : f32
      %12 = vector.broadcast %cst_9 : f32 to vector<8x256xf32>
      %c0_10 = arith.constant 0 : index
      %c0_11 = arith.constant 0 : index
      %13 = vector.load %arg7[%c0_10, %c0_11] : memref<8x256xf32, #tpu.memory_space<vmem>>, vector<8x256xf32>
      tpu.vector_store %arg7[%c0_10, %c0_11], %12 {strides = array<i32>} : memref<8x256xf32, #tpu.memory_space<vmem>>, vector<8x256xf32>,
    } else {
    }
    %c0 = arith.constant 0 : index
    %c0_1 = arith.constant 0 : index
    %3 = vector.load %arg7[%c0, %c0_1] : memref<8x256xf32, #tpu.memory_space<vmem>>, vector<8x256xf32>
    %c0_2 = arith.constant 0 : index
    %c0_3 = arith.constant 0 : index
    %4 = vector.load %arg1[%c0_2, %c0_3] : memref<8x2048xbf16, #tpu.memory_space<vmem>>, vector<8x2048xbf16>
    %c0_4 = arith.constant 0 : index
    %c0_5 = arith.constant 0 : index
    %5 = vector.load %arg2[%c0_4, %c0_5] : memref<2048x256xbf16, #tpu.memory_space<vmem>>, vector<2048x256xbf16>
    %cst = arith.constant dense<0.000000e+00> : vector<8x256xf32>
    %6 = tpu.matmul %4, %5, %cst {dimension_numbers = #tpu.dot_dimension_numbers<[1], [0], [0], [1], [0, 0, 1, 1], [], []>} : vector<8x2048xbf16>, vector<2048x256xbf16>, vector<8x256xf32> -> vector<8x256xf32>
    %7 = arith.addf %3, %6 : vector<8x256xf32>
    %c0_6 = arith.constant 0 : index
    %c0_7 = arith.constant 0 : index
    %8 = vector.load %arg7[%c0_6, %c0_7] : memref<8x256xf32, #tpu.memory_space<vmem>>, vector<8x256xf32>
    tpu.vector_store %arg7[%c0_6, %c0_7], %7 {strides = array<i32>} : memref<8x256xf32, #tpu.memory_space<vmem>>, vector<8x256xf32>,
    %c1_i32 = arith.constant 1 : i32
    %9 = arith.cmpi eq, %arg0, %c1_i32 : i32
    %10 = arith.extui %9 : i1 to i32
    %c0_i32_8 = arith.constant 0 : i32
    %11 = arith.cmpi ne, %10, %c0_i32_8 : i32
    scf.if %11 {
      %c0_9 = arith.constant 0 : index
      %c0_10 = arith.constant 0 : index
      %12 = vector.load %arg7[%c0_9, %c0_10] : memref<8x256xf32, #tpu.memory_space<vmem>>, vector<8x256xf32>
      %cst_11 = arith.constant dense<0.000000e+00> : vector<256xf32>
      %13 = vector.multi_reduction <add>, %12, %cst_11 [0] : vector<8x256xf32> to vector<256xf32>
      %14 = vector.shape_cast %13 : vector<256xf32> to vector<1x256xf32>
      %cst_12 = arith.constant 8.000000e+00 : f32
      %15 = vector.broadcast %cst_12 : f32 to vector<1x256xf32>
      %16 = arith.divf %14, %15 : vector<1x256xf32>
      %17 = arith.mulf %12, %12 : vector<8x256xf32>
      %cst_13 = arith.constant dense<0.000000e+00> : vector<256xf32>
      %18 = vector.multi_reduction <add>, %17, %cst_13 [0] : vector<8x256xf32> to vector<256xf32>
      %19 = vector.shape_cast %18 : vector<256xf32> to vector<1x256xf32>
      %cst_14 = arith.constant 8.000000e+00 : f32
      %20 = vector.broadcast %cst_14 : f32 to vector<1x256xf32>
      %21 = arith.divf %19, %20 : vector<1x256xf32>
      %22 = arith.mulf %16, %16 : vector<1x256xf32>
      %23 = arith.subf %21, %22 : vector<1x256xf32>
      %cst_15 = arith.constant 0.000000e+00 : f32
      %24 = vector.broadcast %cst_15 : f32 to vector<1x256xf32>
      %25 = arith.maximumf %23, %24 : vector<1x256xf32>
      %c0_16 = arith.constant 0 : index
      %c0_17 = arith.constant 0 : index
      %26 = vector.load %arg5[%c0_16, %c0_17] : memref<8x256xf32, #tpu.memory_space<vmem>>, vector<1x256xf32>
      %cst_18 = arith.constant 9.99999974E-6 : f32
      %27 = vector.broadcast %cst_18 : f32 to vector<1x256xf32>
      %28 = arith.addf %25, %27 : vector<1x256xf32>
      %29 = math.rsqrt %28 : vector<1x256xf32>
      %30 = arith.mulf %26, %29 : vector<1x256xf32>
      %c1 = arith.constant 1 : index
      %c0_19 = arith.constant 0 : index
      %31 = vector.load %arg5[%c1, %c0_19] : memref<8x256xf32, #tpu.memory_space<vmem>>, vector<1x256xf32>
      %32 = arith.mulf %16, %30 : vector<1x256xf32>
      %33 = arith.subf %31, %32 : vector<1x256xf32>
      %34 = vector.broadcast %30 : vector<1x256xf32> to vector<8x256xf32>
      %35 = arith.mulf %12, %34 : vector<8x256xf32>
      %36 = vector.broadcast %33 : vector<1x256xf32> to vector<8x256xf32>
      %37 = arith.addf %35, %36 : vector<8x256xf32>
      %cst_20 = arith.constant 0.000000e+00 : f32
      %38 = vector.broadcast %cst_20 : f32 to vector<8x256xf32>
      %39 = arith.maximumf %37, %38 : vector<8x256xf32>
      %40 = arith.truncf %39 : vector<8x256xf32> to vector<8x256xbf16>
      %c0_21 = arith.constant 0 : index
      %c0_22 = arith.constant 0 : index
      %41 = vector.load %arg3[%c0_21, %c0_22] : memref<256x128xbf16, #tpu.memory_space<vmem>>, vector<256x128xbf16>
      %cst_23 = arith.constant dense<0.000000e+00> : vector<8x128xf32>
      %42 = tpu.matmul %40, %41, %cst_23 {dimension_numbers = #tpu.dot_dimension_numbers<[1], [0], [0], [1], [0, 0, 1, 1], [], []>} : vector<8x256xbf16>, vector<256x128xbf16>, vector<8x128xf32> -> vector<8x128xf32>
      %cst_24 = arith.constant dense<0.000000e+00> : vector<128xf32>
      %43 = vector.multi_reduction <add>, %42, %cst_24 [0] : vector<8x128xf32> to vector<128xf32>
      %44 = vector.shape_cast %43 : vector<128xf32> to vector<1x128xf32>
      %cst_25 = arith.constant 8.000000e+00 : f32
      %45 = vector.broadcast %cst_25 : f32 to vector<1x128xf32>
      %46 = arith.divf %44, %45 : vector<1x128xf32>
      %47 = arith.mulf %42, %42 : vector<8x128xf32>
      %cst_26 = arith.constant dense<0.000000e+00> : vector<128xf32>
      %48 = vector.multi_reduction <add>, %47, %cst_26 [0] : vector<8x128xf32> to vector<128xf32>
      %49 = vector.shape_cast %48 : vector<128xf32> to vector<1x128xf32>
      %cst_27 = arith.constant 8.000000e+00 : f32
      %50 = vector.broadcast %cst_27 : f32 to vector<1x128xf32>
      %51 = arith.divf %49, %50 : vector<1x128xf32>
      %52 = arith.mulf %46, %46 : vector<1x128xf32>
      %53 = arith.subf %51, %52 : vector<1x128xf32>
      %cst_28 = arith.constant 0.000000e+00 : f32
      %54 = vector.broadcast %cst_28 : f32 to vector<1x128xf32>
      %55 = arith.maximumf %53, %54 : vector<1x128xf32>
      %c2 = arith.constant 2 : index
      %c0_29 = arith.constant 0 : index
      %56 = vector.load %arg5[%c2, %c0_29] : memref<8x256xf32, #tpu.memory_space<vmem>>, vector<1x128xf32>
      %cst_30 = arith.constant 9.99999974E-6 : f32
      %57 = vector.broadcast %cst_30 : f32 to vector<1x128xf32>
      %58 = arith.addf %55, %57 : vector<1x128xf32>
      %59 = math.rsqrt %58 : vector<1x128xf32>
      %60 = arith.mulf %56, %59 : vector<1x128xf32>
      %c3 = arith.constant 3 : index
      %c0_31 = arith.constant 0 : index
      %61 = vector.load %arg5[%c3, %c0_31] : memref<8x256xf32, #tpu.memory_space<vmem>>, vector<1x128xf32>
      %62 = arith.mulf %46, %60 : vector<1x128xf32>
      %63 = arith.subf %61, %62 : vector<1x128xf32>
      %64 = vector.broadcast %60 : vector<1x128xf32> to vector<8x128xf32>
      %65 = arith.mulf %42, %64 : vector<8x128xf32>
      %66 = vector.broadcast %63 : vector<1x128xf32> to vector<8x128xf32>
      %67 = arith.addf %65, %66 : vector<8x128xf32>
      %cst_32 = arith.constant 0.000000e+00 : f32
      %68 = vector.broadcast %cst_32 : f32 to vector<8x128xf32>
      %69 = arith.maximumf %67, %68 : vector<8x128xf32>
      %70 = arith.truncf %69 : vector<8x128xf32> to vector<8x128xbf16>
      %c0_33 = arith.constant 0 : index
      %c0_34 = arith.constant 0 : index
      %71 = vector.load %arg4[%c0_33, %c0_34] : memref<128x128xbf16, #tpu.memory_space<vmem>>, vector<128x128xbf16>
      %cst_35 = arith.constant dense<0.000000e+00> : vector<8x128xf32>
      %72 = tpu.matmul %70, %71, %cst_35 {dimension_numbers = #tpu.dot_dimension_numbers<[1], [0], [0], [1], [0, 0, 1, 1], [], []>} : vector<8x128xbf16>, vector<128x128xbf16>, vector<8x128xf32> -> vector<8x128xf32>
      %c4 = arith.constant 4 : index
      %c0_36 = arith.constant 0 : index
      %73 = vector.load %arg5[%c4, %c0_36] : memref<8x256xf32, #tpu.memory_space<vmem>>, vector<1x128xf32>
      %74 = vector.broadcast %73 : vector<1x128xf32> to vector<8x128xf32>
      %75 = arith.addf %72, %74 : vector<8x128xf32>
      %c0_37 = arith.constant 0 : index
      %c0_38 = arith.constant 0 : index
      %76 = vector.load %arg6[%c0_37, %c0_38] : memref<8x128xf32, #tpu.memory_space<vmem>>, vector<8x128xf32>
      tpu.vector_store %arg6[%c0_37, %c0_38], %75 {strides = array<i32>} : memref<8x128xf32, #tpu.memory_space<vmem>>, vector<8x128xf32>,
    } else {
    }
    return
  }
  func.func @transform_0(%arg0: i32) -> (i32, i32) {
    %c0_i32 = arith.constant 0 : i32
    %c0_i32_0 = arith.constant 0 : i32
    return %c0_i32, %arg0 : i32, i32
  }
  func.func @transform_1(%arg0: i32) -> (i32, i32) {
    %c0_i32 = arith.constant 0 : i32
    %c0_i32_0 = arith.constant 0 : i32
    return %arg0, %c0_i32 : i32, i32
  }
  func.func @transform_2(%arg0: i32) -> (i32, i32) {
    %c0_i32 = arith.constant 0 : i32
    %c0_i32_0 = arith.constant 0 : i32
    %c0_i32_1 = arith.constant 0 : i32
    return %c0_i32, %c0_i32_0 : i32, i32
  }
  func.func @transform_3(%arg0: i32) -> (i32, i32) {
    %c0_i32 = arith.constant 0 : i32
    %c0_i32_0 = arith.constant 0 : i32
    %c0_i32_1 = arith.constant 0 : i32
    return %c0_i32, %c0_i32_0 : i32, i32
  }
  func.func @transform_4(%arg0: i32) -> (i32, i32) {
    %c0_i32 = arith.constant 0 : i32
    %c0_i32_0 = arith.constant 0 : i32
    %c0_i32_1 = arith.constant 0 : i32
    return %c0_i32, %c0_i32_0 : i32, i32
  }
  func.func @transform_5(%arg0: i32) -> (i32, i32) {
    %c0_i32 = arith.constant 0 : i32
    %c0_i32_0 = arith.constant 0 : i32
    %c0_i32_1 = arith.constant 0 : i32
    return %c0_i32, %c0_i32_0 : i32, i32
  }
}

</mosaic_0001>

<bundles_post_ra>
// kernel: tpu_custom_call.1
= control target key start
LH: loop header
LB: loop body
LE: loop exit
PB: predicated region body
PF: predicated region fallthrough
CT: control target
= control target key end

     0   :  { %s5429_s0 = inlined_call_operand.hbm [shape: bf16[8,4096], index: 0, kind: input, shape index: {}]   ;;  %s5430_s1 = inlined_call_operand.hbm [shape: bf16[4096,256], index: 1, kind: input, shape index: {}]   ;;  %s5431_s2 = inlined_call_operand.hbm [shape: bf16[256,128], index: 2, kind: input, shape index: {}]   ;;  %s5432_s3 = inlined_call_operand.hbm [shape: bf16[128,128], index: 3, kind: input, shape index: {}]   ;;  %s5433_s4 = inlined_call_operand.hbm [shape: f32[8,256], index: 4, kind: input, shape index: {}]   ;;  %s5434_s5 = inlined_call_operand.hbm [shape: f32[8,128], index: 5, kind: output, shape index: {}]  }
   0x1   :  { %5435 = sst [smem:[#allocation18_spill]] %s5431_s2 }
   0x2   :  { %10 = vsyncpa [#allocation4], 0 }
   0x3   :  { %12 = vsyncpa [#allocation4 + $0x1], 0 }
   0x4   :  { %13 = vsyncpa [#allocation7], 0 }
   0x5   :  { %15 = vsyncpa [#allocation7 + $0x1], 0 }
   0x6   :  { %16 = vsyncpa [#allocation10], 0 }
   0x7   :  { %17 = vsyncpa [#allocation5], 0  ;;  %s4633_s18 = smov 0   ;;  %s4635_s19 = smov 0  }
   0x8   :  { %s4637_s20 = smov 0   ;;  %s4639_s21 = smov 0  }
   0x9 LB: > { %s5436_s2 = sld [smem:[#allocation18_spill]]  ;;  %s4657_s25 = sadd.s32 4294967295, %s4591_s21   ;;  %s4591_s21 = sphi %s4639_s21, %s5444_s21   ;;  %s4587_s20 = sphi %s4637_s20, %s5443_s20   ;;  %s4583_s19 = sphi %s4635_s19, %s5442_s19   ;;  %s4579_s18 = sphi %s4633_s18, %s5441_s18  }
   0xa   : > { %p2840_p0 = scmp.ge.s32.totalorder %s4591_s21, 1  ;;  %p44_p1 = scmp.eq.s32.totalorder %s4657_s25, 0 }
   0xb   : > { %p164_p2 = scmp.lt.s32.totalorder %s4591_s21, 3  ;;  %p2841_p3 = scmp.ne.s32.totalorder %s4657_s25, 0 }
   0xc   : > { %s4593_s27 = smov [#allocation8]   ;;  %s189_s6 = sshll.u32 %s5432_s3, 4  ;;  %s190_s6 = int_to_ptr.hbm [resolvable:$true] %s189_s6 }
   0xd   : > { %p4663_p4 = pnand %p2840_p0, %p164_p2  ;;  %s177_s28 = sshll.u32 %s4593_s27, 4  ;;  %s178_s28 = int_to_ptr.vmem [resolvable:$true] %s177_s28 }
   0xe   : > { %s204_s10 = sshll.u32 %s5433_s4, 4  ;;  %s4594_s11 = smov [#allocation9]   ;;  %s205_s10 = int_to_ptr.hbm [resolvable:$true] %s204_s10 }
   0xf   : > { %s175_s24 = sshll.u32 %s5436_s2, 4  ;;  %p4287_p5 = pneg %p4663_p4  ;;  %s176_s24 = int_to_ptr.hbm [resolvable:$true] %s175_s24 }
  0x10   : > { %s191_s12 = sshll.u32 %s4594_s11, 4  ;;  %s4595_s13 = smov 64   ;;  %s192_s12 = int_to_ptr.vmem [resolvable:$true] %s191_s12 }
  0x11   : > { %p4674_p6 = pnand %p4287_p5, %p44_p1  ;;  %s4596_s14 = smov 4  }
  0x12   : > { %s4597_s15 = smov [#allocation11]   ;;  %s4688_s17 = sadd.s32 1, %s4591_s21  }
  0x13   : > { %4290 = dma.hbm_to_vmem [thread:$0]  (!%p4674_p6), %s176_s24, 2048, %s178_s28, [#allocation7], %s4595_s13, %s4595_s13, %s4596_s14  }
  0x14   : > { %4293 = dma.hbm_to_vmem [thread:$0]  (!%p4674_p6), %s190_s6, 1024, %s192_s12, [#allocation10], %s4595_s13, %s4595_s13, %s4596_s14  }
  0x15   : > { %s206_s16 = sshll.u32 %s4597_s15, 4  ;;  %s27_s22 = ssub.s32 %s4591_s21, %s4688_s17  ;;  %s207_s16 = int_to_ptr.vmem [resolvable:$true] %s206_s16 }
  0x16   : > { %4296 = dma.hbm_to_vmem [thread:$0]  (!%p4674_p6), %s205_s10, 256, %s207_s16, [#allocation10]  }
  0x17   : > { %s30_s23 = sadd.s32 1, %s4587_s20  ;;  %p28_p7 = scmp.eq.s32.totalorder %s27_s22, 0 }
  0x18   : > { %p37_p8 = scmp.ne.s32.totalorder %s4587_s20, %s4583_s19  ;;  %p38_p9 = scmp.eq.s32.totalorder %s4591_s21, 0 }
  0x19   : > { %p43_p10 = scmp.ne.s32.totalorder %s4583_s19, %s4579_s18  ;;  %p4307_p13 = scmp.lt.s32.totalorder %s4591_s21, 2 }
  0x1a   : > { %s4699_s24 = scalar_select %p28_p7, %s4587_s20, %s30_s23  }
  0x1b   : > { %p39_p11 = por %p38_p9, %p37_p8  ;;  %p4703_p12 = por %p44_p1, %p43_p10 }
  0x1c   : > { %s217_s28 = sand.u32 1, %s4587_s20   ;;  %s3984_s30 = sshll.u32 %s4591_s21, 6 }
  0x1d   : > { %s2845_s29 = sshll.u32 %s217_s28, 6  ;;  %s226_s8 = scalar_lea.hbm %s5429_s0, %s3984_s30 }
  0x1e   : > { %s221_s9 = scalar_lea.vmem [#allocation3], %s2845_s29  ;;  %s228_s18 = sshll.u32 %s226_s8, 4  ;;  %s229_s18 = int_to_ptr.hbm [resolvable:$true] %s228_s18 }
  0x1f   : > { %s230_s10 = sshll.u32 %s221_s9, 4  ;;  %p4713_p0 = pnand %p4307_p13, %p39_p11  ;;  %s231_s10 = int_to_ptr.vmem [resolvable:$true] %s230_s10 }
  0x20   : > { %s2848_s12 = sshll.u32 %s217_s28, 11  ;;  %s237_s13 = sand.u32 1, %s4591_s21  }
  0x21   : > { %s218_s14 = scalar_lea.sflag [#allocation4], %s217_s28  ;;  %s4453_s15 = sshra.s32 %s229_s18, 4  ;;  %s4454_s15 = int_to_ptr.hbm [resolvable:$true] %s4453_s15 }
  0x22   : > { %s4455_s16 = scalar_lea.hbm %s4454_s15, 64  ;;  %p4457_p5 = pneg %p4713_p0 }
  0x23   : > { %p4456_p2 = scmp.ne.s32.totalorder %s4454_s15, %s4455_s16  ;;  %s4460_s29 = scalar_lea.hbm %s5429_s0, 128 }
  0x24   : > { %p4461_p8 = scmp.lt.s32.totalorder %s4454_s15, %s5429_s0  ;;  %p4462_p9 = scmp.lt.s32.totalorder %s4460_s29, %s4455_s16 }
  0x25   : > { %p4458_p6 = pnand %p4457_p5, %p4456_p2 }
  0x26   : > { %p4463_p10 = por %p4462_p9, %p4461_p8 }
  0x27   : > { %p4459_p7 = pneg %p4458_p6 }
  0x29   : > { %p4464_p11 = pnand %p4463_p10, %p4459_p7 }
  0x2b   : > { %4467 = shalt.err (!%p4464_p11)
}
  0x2c   : > { %4300 = dma.hbm_to_vmem [thread:$0]  (!%p4713_p0), %s229_s18, 1024, %s231_s10, %s218_s14  }
  0x2d   : > { %s241_s28 = scalar_lea.vmem [#allocation6], %s2848_s12  ;;  %s3986_s8 = sshll.u32 %s4591_s21, 11 }
  0x2e   : > { %s250_s7 = sshll.u32 %s241_s28, 4  ;;  %s247_s23 = scalar_lea.hbm %s5430_s1, %s3986_s8  ;;  %s251_s7 = int_to_ptr.vmem [resolvable:$true] %s250_s7 }
  0x2f   : > { %s248_s2 = sshll.u32 %s247_s23, 4  ;;  %s238_s15 = scalar_lea.sflag [#allocation7], %s237_s13  ;;  %s249_s2 = int_to_ptr.hbm [resolvable:$true] %s248_s2 }
  0x30   : > { %s4483_s16 = sshra.s32 %s249_s2, 4  ;;  %s4490_s12 = scalar_lea.hbm %s5430_s1, 4096  ;;  %s4484_s16 = int_to_ptr.hbm [resolvable:$true] %s4483_s16 }
  0x31   : > { %s4485_s29 = scalar_lea.hbm %s4484_s16, 2048  ;;  %p4491_p7 = scmp.lt.s32.totalorder %s4484_s16, %s5430_s1 }
  0x32   : > { %p4486_p13 = scmp.ne.s32.totalorder %s4484_s16, %s4485_s29  ;;  %p4492_p8 = scmp.lt.s32.totalorder %s4490_s12, %s4485_s29 }
  0x34   : > { %p4488_p2 = pnand %p4486_p13, %p4457_p5  ;;  %p4493_p9 = por %p4492_p8, %p4491_p7 }
  0x36   : > { %p4489_p6 = pneg %p4488_p2 }
  0x38   : > { %p4494_p10 = pnand %p4493_p9, %p4489_p6 }
  0x3a   : > { %4497 = shalt.err (!%p4494_p10)
}
  0x3b   : > { %s4598_s13 = smov 128   ;;  %s4599_s30 = smov 8  }
  0x3c   : > { %4303 = dma.hbm_to_vmem [thread:$0]  (!%p4713_p0), %s249_s2, 32768, %s251_s7, %s238_s15, %s4598_s13, %s4598_s13, %s4599_s30  }
  0x3d   : > { %262 = sbr.rel (%p4663_p4) target bundleno = 876 (0x36c), region = 40  ;;  %s264_s6 = sand.u32 (!%p4663_p4), 1, %s4583_s19  }
  0x3e   : > { %s2853_s28 = sshll.u32 (!%p4663_p4), %s264_s6, 6  ;;  %s265_s8 = scalar_lea.sflag (!%p4663_p4), [#allocation4], %s264_s6 }
  0x3f   : > { %s4749_s9 = scalar_lea.vmem (!%p4663_p4), [#allocation3], %s2853_s28 }
  0x42   : > { %4558 = dma.done.wait (%p4703_p12), %s265_s8, 1024  }
  0x43   : > { %4560 = vsyncadd (%p4703_p12), %s265_s8, 4294966272  ;;  %s274_s22 = sand.u32 1, %s4657_s25   ;;  %s2854_s11 = sshll.u32 %s264_s6, 11 }
  0x44   : > { %s275_s2 = scalar_lea.sflag [#allocation7], %s274_s22  ;;  %s4756_s7 = scalar_lea.vmem [#allocation6], %s2854_s11 }
  0x45   : > { %4562 = dma.done.wait (%p4703_p12), %s275_s2, 32768  }
  0x46   : > { %4564 = vsyncadd (%p4703_p12), %s275_s2, 4294934528 }
  0x47   : > { %4566 = dma.done.wait (%p44_p1), [#allocation7], 2048  }
  0x48   : > { %4568 = vsyncadd (%p44_p1), [#allocation7], 4294965248 }
  0x49   : > { %4570 = dma.done.wait (%p44_p1), [#allocation10], 1280  }
  0x4a   : > { %4572 = vsyncadd (%p44_p1), [#allocation10], 4294966016  ;;  %326 = sbr.rel (%p2841_p3) target bundleno = 82 (0x52), region = 64 }
  0x4f   : > { %v4600_v0 = vmov 0.0  }
  0x50   : > { %327 = vst [vmem:[#allocation2] sm:$0xff] %v4600_v0 }
  0x51   : > { %328 = vst [vmem:[#allocation2 + $0x8] sm:$0xff] %v4600_v0 }
  0x52 PF: > { %v2917_v1 = vld [vmem:[%s4756_s7 + $0x70] sm:$0xf]  ;;  %v4002_v2 = vld [vmem:[%s4756_s7 + $0x74] sm:$0xf0]  ;;  %v2909_v12 = vld [vmem:[%s4756_s7 + $0x60] sm:$0xf] }
  0x53   : > { %v2981_v3 = vld [vmem:[%s4756_s7 + $0xf0] sm:$0xf]  ;;  %v2918_v4 = vor.u32 %v4002_v2, %v2917_v1  ;;  %v4018_v5 = vld [vmem:[%s4756_s7 + $0xf4] sm:$0xf0]  ;;  %v4000_v14 = vld [vmem:[%s4756_s7 + $0x64] sm:$0xf0] }
  0x54   : > { %v3045_v6 = vld [vmem:[%s4756_s7 + $0x170] sm:$0xf]  ;;  %v4034_v7 = vld [vmem:[%s4756_s7 + $0x174] sm:$0xf0]  ;;  %v2982_v8 = vor.u32 %v4018_v5, %v2981_v3  ;;  %v2973_v15 = vld [vmem:[%s4756_s7 + $0xe0] sm:$0xf]  ;;  %v2910_v17 = vor.u32 %v4000_v14, %v2909_v12 }
  0x55   : > { %v3046_v9 = vor.u32 %v4034_v7, %v3045_v6  ;;  %v3109_v10 = vld [vmem:[%s4756_s7 + $0x1f0] sm:$0xf]  ;;  %v4050_v11 = vld [vmem:[%s4756_s7 + $0x1f4] sm:$0xf0]  ;;  %1931 = vmatpush.bf16.msra.mxu0 %v2918_v4  ;;  %v4016_v16 = vld [vmem:[%s4756_s7 + $0xe4] sm:$0xf0] }
  0x56   : > { %v3110_v13 = vor.u32 %v4050_v11, %v3109_v10  ;;  %1944 = vmatpush.bf16.msra.mxu1 %v2982_v8  ;;  %v2974_v18 = vor.u32 %v4016_v16, %v2973_v15  ;;  %v3037_v19 = vld [vmem:[%s4756_s7 + $0x160] sm:$0xf]  ;;  %v4032_v20 = vld [vmem:[%s4756_s7 + $0x164] sm:$0xf0]  ;;  %v2901_v24 = vld [vmem:[%s4756_s7 + $0x50] sm:$0xf] }
  0x57   : > { %1957 = vmatpush.bf16.msra.mxu2 %v3046_v9  ;;  %v3101_v21 = vld [vmem:[%s4756_s7 + $0x1e0] sm:$0xf]  ;;  %v3038_v22 = vor.u32 %v4032_v20, %v3037_v19  ;;  %v4048_v23 = vld [vmem:[%s4756_s7 + $0x1e4] sm:$0xf0]  ;;  %v3998_v25 = vld [vmem:[%s4756_s7 + $0x54] sm:$0xf0] }
  0x58   : > { %1970 = vmatpush.bf16.msra.mxu3 %v3110_v13  ;;  %v3102_v26 = vor.u32 %v4048_v23, %v3101_v21  ;;  %v2965_v27 = vld [vmem:[%s4756_s7 + $0xd0] sm:$0xf]  ;;  %v4014_v28 = vld [vmem:[%s4756_s7 + $0xd4] sm:$0xf0]  ;;  %v2902_v30 = vor.u32 %v3998_v25, %v2901_v24  ;;  %v2893_v36 = vld [vmem:[%s4756_s7 + $0x40] sm:$0xf] }
  0x59   : > { %v3029_v29 = vld [vmem:[%s4756_s7 + $0x150] sm:$0xf]  ;;  %1932 = vmatpush.bf16.msra.mxu0 %v2910_v17  ;;  %v4030_v31 = vld [vmem:[%s4756_s7 + $0x154] sm:$0xf0]  ;;  %v2966_v34 = vor.u32 %v4014_v28, %v2965_v27  ;;  %v3996_v37 = vld [vmem:[%s4756_s7 + $0x44] sm:$0xf0] }
  0x5a   : > { %v3093_v32 = vld [vmem:[%s4756_s7 + $0x1d0] sm:$0xf]  ;;  %v4046_v33 = vld [vmem:[%s4756_s7 + $0x1d4] sm:$0xf0]  ;;  %1945 = vmatpush.bf16.msra.mxu1 %v2974_v18  ;;  %v3030_v35 = vor.u32 %v4030_v31, %v3029_v29  ;;  %v2957_v38 = vld [vmem:[%s4756_s7 + $0xc0] sm:$0xf]  ;;  %v2894_v45 = vor.u32 %v3996_v37, %v2893_v36 }
  0x5b   : > { %1958 = vmatpush.bf16.msra.mxu2 %v3038_v22  ;;  %v3094_v39 = vor.u32 %v4046_v33, %v3093_v32  ;;  %v4012_v40 = vld [vmem:[%s4756_s7 + $0xc4] sm:$0xf0]  ;;  %v3021_v41 = vld [vmem:[%s4756_s7 + $0x140] sm:$0xf]  ;;  %v2885_v48 = vld [vmem:[%s4756_s7 + $0x30] sm:$0xf] }
  0x5c   : > { %1971 = vmatpush.bf16.msra.mxu3 %v3102_v26  ;;  %v4028_v42 = vld [vmem:[%s4756_s7 + $0x144] sm:$0xf0]  ;;  %v3085_v43 = vld [vmem:[%s4756_s7 + $0x1c0] sm:$0xf]  ;;  %v2958_v46 = vor.u32 %v4012_v40, %v2957_v38  ;;  %v3994_v49 = vld [vmem:[%s4756_s7 + $0x34] sm:$0xf0] }
  0x5d   : > { %v4044_v44 = vld [vmem:[%s4756_s7 + $0x1c4] sm:$0xf0]  ;;  %1933 = vmatpush.bf16.msra.mxu0 %v2902_v30  ;;  %v3022_v47 = vor.u32 %v4028_v42, %v3021_v41  ;;  %v2949_v50 = vld [vmem:[%s4756_s7 + $0xb0] sm:$0xf]  ;;  %v4010_v52 = vld [vmem:[%s4756_s7 + $0xb4] sm:$0xf0]  ;;  %v2886_v57 = vor.u32 %v3994_v49, %v2885_v48 }
  0x5e   : > { %1946 = vmatpush.bf16.msra.mxu1 %v2966_v34  ;;  %v3086_v51 = vor.u32 %v4044_v44, %v3085_v43  ;;  %v3013_v53 = vld [vmem:[%s4756_s7 + $0x130] sm:$0xf]  ;;  %v4026_v54 = vld [vmem:[%s4756_s7 + $0x134] sm:$0xf0]  ;;  %v2950_v58 = vor.u32 %v4010_v52, %v2949_v50  ;;  %v2877_v60 = vld [vmem:[%s4756_s7 + $0x20] sm:$0xf] }
  0x5f   : > { %1959 = vmatpush.bf16.msra.mxu2 %v3030_v35  ;;  %v3077_v55 = vld [vmem:[%s4756_s7 + $0x1b0] sm:$0xf]  ;;  %v4042_v56 = vld [vmem:[%s4756_s7 + $0x1b4] sm:$0xf0]  ;;  %v3014_v59 = vor.u32 %v4026_v54, %v3013_v53  ;;  %v3992_v61 = vld [vmem:[%s4756_s7 + $0x24] sm:$0xf0] }
  0x60   : > { %1972 = vmatpush.bf16.msra.mxu3 %v3094_v39  ;;  %v2941_v62 = vld [vmem:[%s4756_s7 + $0xa0] sm:$0xf]  ;;  %v3078_v63 = vor.u32 %v4042_v56, %v3077_v55  ;;  %v4008_v0 = vld [vmem:[%s4756_s7 + $0xa4] sm:$0xf0]  ;;  %v2878_v5 = vor.u32 %v3992_v61, %v2877_v60  ;;  %v2869_v8 = vld [vmem:[%s4756_s7 + $0x10] sm:$0xf] }
  0x61   : > { %1934 = vmatpush.bf16.msra.mxu0 %v2894_v45  ;;  %v3005_v1 = vld [vmem:[%s4756_s7 + $0x120] sm:$0xf]  ;;  %v4024_v2 = vld [vmem:[%s4756_s7 + $0x124] sm:$0xf0]  ;;  %v2942_v6 = vor.u32 %v4008_v0, %v2941_v62  ;;  %v3990_v9 = vld [vmem:[%s4756_s7 + $0x14] sm:$0xf0] }
  0x62   : > { %1947 = vmatpush.bf16.msra.mxu1 %v2958_v46  ;;  %v3069_v3 = vld [vmem:[%s4756_s7 + $0x1a0] sm:$0xf]  ;;  %v4040_v4 = vld [vmem:[%s4756_s7 + $0x1a4] sm:$0xf0]  ;;  %v3006_v7 = vor.u32 %v4024_v2, %v3005_v1  ;;  %v2933_v10 = vld [vmem:[%s4756_s7 + $0x90] sm:$0xf]  ;;  %v2870_v17 = vor.u32 %v3990_v9, %v2869_v8 }
  0x63   : > { %1960 = vmatpush.bf16.msra.mxu2 %v3022_v47  ;;  %v3070_v11 = vor.u32 %v4040_v4, %v3069_v3  ;;  %v4006_v12 = vld [vmem:[%s4756_s7 + $0x94] sm:$0xf0]  ;;  %v2997_v13 = vld [vmem:[%s4756_s7 + $0x110] sm:$0xf]  ;;  %v2861_v18 = vld [vmem:[%s4756_s7] sm:$0xf] }
  0x64   : > { %1973 = vmatpush.bf16.msra.mxu3 %v3086_v51  ;;  %v4022_v14 = vld [vmem:[%s4756_s7 + $0x114] sm:$0xf0]  ;;  %v3061_v15 = vld [vmem:[%s4756_s7 + $0x190] sm:$0xf]  ;;  %v3988_v19 = vld [vmem:[%s4756_s7 + $0x4] sm:$0xf0]  ;;  %v2934_v20 = vor.u32 %v4006_v12, %v2933_v10 }
  0x65   : > { %1935 = vmatpush.bf16.msra.mxu0 %v2886_v57  ;;  %v4038_v16 = vld [vmem:[%s4756_s7 + $0x194] sm:$0xf0]  ;;  %v2998_v21 = vor.u32 %v4022_v14, %v2997_v13  ;;  %v2925_v22 = vld [vmem:[%s4756_s7 + $0x80] sm:$0xf]  ;;  %v4004_v23 = vld [vmem:[%s4756_s7 + $0x84] sm:$0xf0]  ;;  %v2862_v32 = vor.u32 %v3988_v19, %v2861_v18 }
  0x66   : > { %1948 = vmatpush.bf16.msra.mxu1 %v2950_v58  ;;  %v2989_v24 = vld [vmem:[%s4756_s7 + $0x100] sm:$0xf]  ;;  %v3062_v25 = vor.u32 %v4038_v16, %v3061_v15  ;;  %v4020_v26 = vld [vmem:[%s4756_s7 + $0x104] sm:$0xf0]  ;;  %v3173_v29 = vld [vmem:[%s4756_s7 + $0x270] sm:$0xf]  ;;  %v2926_v36 = vor.u32 %v4004_v23, %v2925_v22 }
  0x67   : > { %1961 = vmatpush.bf16.msra.mxu2 %v3014_v59  ;;  %v3053_v27 = vld [vmem:[%s4756_s7 + $0x180] sm:$0xf]  ;;  %v4036_v28 = vld [vmem:[%s4756_s7 + $0x184] sm:$0xf0]  ;;  %v4066_v30 = vld [vmem:[%s4756_s7 + $0x274] sm:$0xf0]  ;;  %v2990_v37 = vor.u32 %v4020_v26, %v2989_v24 }
  0x68   : > { %1974 = vmatpush.bf16.msra.mxu3 %v3078_v63  ;;  %v3237_v31 = vld [vmem:[%s4756_s7 + $0x2f0] sm:$0xf]  ;;  %v4082_v33 = vld [vmem:[%s4756_s7 + $0x2f4] sm:$0xf0]  ;;  %v3054_v40 = vor.u32 %v4036_v28, %v3053_v27  ;;  %v3174_v41 = vor.u32 %v4066_v30, %v3173_v29  ;;  %v3165_v44 = vld [vmem:[%s4756_s7 + $0x260] sm:$0xf] }
  0x69   : > { %1936 = vmatpush.bf16.msra.mxu0 %v2878_v5  ;;  %v3301_v34 = vld [vmem:[%s4756_s7 + $0x370] sm:$0xf]  ;;  %v4098_v35 = vld [vmem:[%s4756_s7 + $0x374] sm:$0xf0]  ;;  %v3238_v42 = vor.u32 %v4082_v33, %v3237_v31  ;;  %v4064_v45 = vld [vmem:[%s4756_s7 + $0x264] sm:$0xf0] }
  0x6a   : > { %1949 = vmatpush.bf16.msra.mxu1 %v2942_v6  ;;  %v3365_v38 = vld [vmem:[%s4756_s7 + $0x3f0] sm:$0xf]  ;;  %v4114_v39 = vld [vmem:[%s4756_s7 + $0x3f4] sm:$0xf0]  ;;  %v3302_v43 = vor.u32 %v4098_v35, %v3301_v34  ;;  %v3229_v46 = vld [vmem:[%s4756_s7 + $0x2e0] sm:$0xf]  ;;  %v3166_v53 = vor.u32 %v4064_v45, %v3165_v44 }
  0x6b   : > { %1962 = vmatpush.bf16.msra.mxu2 %v3006_v7  ;;  %v3366_v47 = vor.u32 %v4114_v39, %v3365_v38  ;;  %v4080_v48 = vld [vmem:[%s4756_s7 + $0x2e4] sm:$0xf0]  ;;  %v3293_v49 = vld [vmem:[%s4756_s7 + $0x360] sm:$0xf]  ;;  %v3157_v54 = vld [vmem:[%s4756_s7 + $0x250] sm:$0xf] }
  0x6c   : > { %1975 = vmatpush.bf16.msra.mxu3 %v3070_v11  ;;  %v4096_v50 = vld [vmem:[%s4756_s7 + $0x364] sm:$0xf0]  ;;  %v3357_v51 = vld [vmem:[%s4756_s7 + $0x3e0] sm:$0xf]  ;;  %v3230_v55 = vor.u32 %v4080_v48, %v3229_v46  ;;  %v4062_v57 = vld [vmem:[%s4756_s7 + $0x254] sm:$0xf0] }
  0x6d   : > { %1937 = vmatpush.bf16.msra.mxu0 %v2870_v17  ;;  %v4112_v52 = vld [vmem:[%s4756_s7 + $0x3e4] sm:$0xf0]  ;;  %v3294_v56 = vor.u32 %v4096_v50, %v3293_v49  ;;  %v3221_v58 = vld [vmem:[%s4756_s7 + $0x2d0] sm:$0xf]  ;;  %v4078_v61 = vld [vmem:[%s4756_s7 + $0x2d4] sm:$0xf0]  ;;  %v3158_v4 = vor.u32 %v4062_v57, %v3157_v54 }
  0x6e   : > { %1950 = vmatpush.bf16.msra.mxu1 %v2934_v20  ;;  %v332_v59 = vld [vmem:[%s4749_s9 + $0x8] sm:$0xff]  ;;  %v3358_v60 = vor.u32 %v4112_v52, %v3357_v51  ;;  %v3285_v62 = vld [vmem:[%s4756_s7 + $0x350] sm:$0xf]  ;;  %v4094_v63 = vld [vmem:[%s4756_s7 + $0x354] sm:$0xf0]  ;;  %v3222_v8 = vor.u32 %v4078_v61, %v3221_v58  ;;  %p3883_p1 = scmp.ne.s32.totalorder %s4657_s25, 1 }
  0x6f   : > { %1963 = vmatpush.bf16.msra.mxu2 %v2998_v21  ;;  %v605_v0 = vunpack.c.l.b16 %v332_v59  ;;  %v606_v1 = vunpack.c.h.b16 %v332_v59  ;;  %v3349_v2 = vld [vmem:[%s4756_s7 + $0x3d0] sm:$0xf]  ;;  %v4110_v3 = vld [vmem:[%s4756_s7 + $0x3d4] sm:$0xf0]  ;;  %v331_v6 = vld [vmem:[%s4749_s9] sm:$0xff]  ;;  %v3286_v9 = vor.u32 %v4094_v63, %v3285_v62 }
  0x70   : > { %1976 = vmatpush.bf16.msra.mxu3 %v3062_v25  ;;  %v3149_v10 = vld [vmem:[%s4756_s7 + $0x240] sm:$0xf]  ;;  %v4060_v11 = vld [vmem:[%s4756_s7 + $0x244] sm:$0xf0]  ;;  %v603_v13 = vunpack.c.l.b16 %v331_v6  ;;  %v604_v14 = vunpack.c.h.b16 %v331_v6  ;;  %v3350_v15 = vor.u32 %v4110_v3, %v3349_v2  ;;  %v3141_v26 = vld [vmem:[%s4756_s7 + $0x230] sm:$0xf] }
  0x71   : > { %1938 = vmatpush.bf16.msra.mxu0 %v2862_v32  ;;  %v4861_v5 = vpack.c.b16 %v605_v0, %v605_v0  ;;  %v4864_v7 = vpack.c.b16 %v606_v1, %v606_v1  ;;  %v3213_v12 = vld [vmem:[%s4756_s7 + $0x2c0] sm:$0xf]  ;;  %v4076_v16 = vld [vmem:[%s4756_s7 + $0x2c4] sm:$0xf0]  ;;  %v3150_v23 = vor.u32 %v4060_v11, %v3149_v10  ;;  %v4058_v27 = vld [vmem:[%s4756_s7 + $0x234] sm:$0xf0] }
  0x72   : > { %1951 = vmatpush.bf16.msra.mxu1 %v2926_v36  ;;  %v3277_v17 = vld [vmem:[%s4756_s7 + $0x340] sm:$0xf]  ;;  %v4092_v18 = vld [vmem:[%s4756_s7 + $0x344] sm:$0xf0]  ;;  %v4875_v21 = vpack.c.b16 %v603_v13, %v603_v13  ;;  %v4878_v22 = vpack.c.b16 %v604_v14, %v604_v14  ;;  %v3214_v24 = vor.u32 %v4076_v16, %v3213_v12  ;;  %v3205_v28 = vld [vmem:[%s4756_s7 + $0x2b0] sm:$0xf]  ;;  %v3142_v35 = vor.u32 %v4058_v27, %v3141_v26 }
  0x73   : > { %1964 = vmatpush.bf16.msra.mxu2 %v2990_v37  ;;  %v3341_v19 = vld [vmem:[%s4756_s7 + $0x3c0] sm:$0xf]  ;;  %v4108_v20 = vld [vmem:[%s4756_s7 + $0x3c4] sm:$0xf0]  ;;  %v3278_v25 = vor.u32 %v4092_v18, %v3277_v17  ;;  %v4074_v30 = vld [vmem:[%s4756_s7 + $0x2b4] sm:$0xf0] }
  0x74   : > { %1977 = vmatpush.bf16.msra.mxu3 %v3054_v40  ;;  %v3342_v29 = vor.u32 %v4108_v20, %v3341_v19  ;;  %v3269_v31 = vld [vmem:[%s4756_s7 + $0x330] sm:$0xf]  ;;  %v4090_v32 = vld [vmem:[%s4756_s7 + $0x334] sm:$0xf0]  ;;  %1939 = vmatmul.bf16.vlgmr.msra.gmra.mxu0 %v4875_v21  ;;  %v3206_v36 = vor.u32 %v4074_v30, %v3205_v28  ;;  %v3133_v38 = vld [vmem:[%s4756_s7 + $0x220] sm:$0xf] }
  0x75   : > { %1983 = vmatpush.bf16.msrb.mxu0 %v3174_v41  ;;  %v3333_v33 = vld [vmem:[%s4756_s7 + $0x3b0] sm:$0xf]  ;;  %v4106_v34 = vld [vmem:[%s4756_s7 + $0x3b4] sm:$0xf0]  ;;  %1952 = vmatmul.bf16.vlgmr.msra.gmra.mxu1 %v4878_v22  ;;  %v3270_v37 = vor.u32 %v4090_v32, %v3269_v31  ;;  %v4056_v39 = vld [vmem:[%s4756_s7 + $0x224] sm:$0xf0] }
  0x76   : > { %1996 = vmatpush.bf16.msrb.mxu1 %v3238_v42  ;;  %1965 = vmatmul.bf16.vlgmr.msra.gmra.mxu2 %v4861_v5  ;;  %v3197_v40 = vld [vmem:[%s4756_s7 + $0x2a0] sm:$0xf]  ;;  %v3334_v41 = vor.u32 %v4106_v34, %v3333_v33  ;;  %v4072_v42 = vld [vmem:[%s4756_s7 + $0x2a4] sm:$0xf0]  ;;  %v3125_v50 = vld [vmem:[%s4756_s7 + $0x210] sm:$0xf] }
  0x77   : > { %2009 = vmatpush.bf16.msrb.mxu2 %v3302_v43  ;;  %1978 = vmatmul.bf16.vlgmr.msra.gmra.mxu3 %v4864_v7  ;;  %v3261_v43 = vld [vmem:[%s4756_s7 + $0x320] sm:$0xf]  ;;  %v4088_v44 = vld [vmem:[%s4756_s7 + $0x324] sm:$0xf0]  ;;  %v3198_v48 = vor.u32 %v4072_v42, %v3197_v40  ;;  %v4054_v51 = vld [vmem:[%s4756_s7 + $0x214] sm:$0xf0] }
  0x78   : > { %2022 = vmatpush.bf16.msrb.mxu3 %v3366_v47  ;;  %v3325_v45 = vld [vmem:[%s4756_s7 + $0x3a0] sm:$0xf]  ;;  %v4104_v46 = vld [vmem:[%s4756_s7 + $0x3a4] sm:$0xf0]  ;;  %v3134_v47 = vor.u32 %v4056_v39, %v3133_v38  ;;  %v3262_v49 = vor.u32 %v4088_v44, %v3261_v43  ;;  %v3189_v52 = vld [vmem:[%s4756_s7 + $0x290] sm:$0xf] }
  0x79   : > { %1984 = vmatpush.bf16.msrb.mxu0 %v3166_v53  ;;  %v3326_v53 = vor.u32 %v4104_v46, %v3325_v45  ;;  %v4070_v54 = vld [vmem:[%s4756_s7 + $0x294] sm:$0xf0]  ;;  %v3317_v57 = vld [vmem:[%s4756_s7 + $0x390] sm:$0xf]  ;;  %v3117_v59 = vld [vmem:[%s4756_s7 + $0x200] sm:$0xf] }
  0x7a   : > { %1997 = vmatpush.bf16.msrb.mxu1 %v3230_v55  ;;  %v3253_v55 = vld [vmem:[%s4756_s7 + $0x310] sm:$0xf]  ;;  %v4102_v58 = vld [vmem:[%s4756_s7 + $0x394] sm:$0xf0]  ;;  %v4052_v61 = vld [vmem:[%s4756_s7 + $0x204] sm:$0xf0]  ;;  %v3190_v0 = vor.u32 %v4070_v54, %v3189_v52 }
  0x7b   : > { %2010 = vmatpush.bf16.msrb.mxu2 %v3294_v56  ;;  %v4086_v56 = vld [vmem:[%s4756_s7 + $0x314] sm:$0xf0]  ;;  %v3181_v62 = vld [vmem:[%s4756_s7 + $0x280] sm:$0xf]  ;;  %v4068_v63 = vld [vmem:[%s4756_s7 + $0x284] sm:$0xf0]  ;;  %v3318_v6 = vor.u32 %v4102_v58, %v3317_v57  ;;  %v3118_v14 = vor.u32 %v4052_v61, %v3117_v59 }
  0x7c   : > { %2023 = vmatpush.bf16.msrb.mxu3 %v3358_v60  ;;  %v3126_v60 = vor.u32 %v4054_v51, %v3125_v50  ;;  %v3254_v1 = vor.u32 %v4086_v56, %v3253_v55  ;;  %v3245_v2 = vld [vmem:[%s4756_s7 + $0x300] sm:$0xf]  ;;  %v4084_v3 = vld [vmem:[%s4756_s7 + $0x304] sm:$0xf0]  ;;  %v333_v10 = vld [vmem:[%s4749_s9 + $0x10] sm:$0xff]  ;;  %v3182_v19 = vor.u32 %v4068_v63, %v3181_v62 }
  0x7d   : > { %1985 = vmatpush.bf16.msrb.mxu0 %v3158_v4  ;;  %v334_v4 = vld [vmem:[%s4749_s9 + $0x18] sm:$0xff]  ;;  %v3429_v11 = vld [vmem:[%s4756_s7 + $0x470] sm:$0xf]  ;;  %v3246_v20 = vor.u32 %v4084_v3, %v3245_v2  ;;  %v3421_v32 = vld [vmem:[%s4756_s7 + $0x460] sm:$0xf] }
  0x7e   : > { %1998 = vmatpush.bf16.msrb.mxu1 %v3222_v8  ;;  %v3309_v8 = vld [vmem:[%s4756_s7 + $0x380] sm:$0xf]  ;;  %v4130_v12 = vld [vmem:[%s4756_s7 + $0x474] sm:$0xf0]  ;;  %v3493_v13 = vld [vmem:[%s4756_s7 + $0x4f0] sm:$0xf]  ;;  %v609_v18 = vunpack.c.l.b16 %v334_v4  ;;  %v610_v26 = vunpack.c.h.b16 %v334_v4 }
  0x7f   : > { %2011 = vmatpush.bf16.msrb.mxu2 %v3286_v9  ;;  %v4100_v9 = vld [vmem:[%s4756_s7 + $0x384] sm:$0xf0]  ;;  %v3557_v16 = vld [vmem:[%s4756_s7 + $0x570] sm:$0xf]  ;;  %v4162_v17 = vld [vmem:[%s4756_s7 + $0x574] sm:$0xf0]  ;;  %v3430_v28 = vor.u32 %v4130_v12, %v3429_v11 }
  0x80   : > { %2024 = vmatpush.bf16.msrb.mxu3 %v3350_v15  ;;  %v4146_v15 = vld [vmem:[%s4756_s7 + $0x4f4] sm:$0xf0]  ;;  %v3310_v27 = vor.u32 %v4100_v9, %v3309_v8  ;;  %v3558_v31 = vor.u32 %v4162_v17, %v3557_v16  ;;  %v4128_v33 = vld [vmem:[%s4756_s7 + $0x464] sm:$0xf0]  ;;  %v3485_v34 = vld [vmem:[%s4756_s7 + $0x4e0] sm:$0xf]  ;;  %v4930_v39 = vpack.c.b16 %v609_v18, %v609_v18  ;;  %v4936_v43 = vpack.c.b16 %v610_v26, %v610_v26 }
  0x81   : > { %1986 = vmatpush.bf16.msrb.mxu0 %v3150_v23  ;;  %v3621_v23 = vld [vmem:[%s4756_s7 + $0x5f0] sm:$0xf]  ;;  %v3494_v30 = vor.u32 %v4146_v15, %v3493_v13  ;;  %v4160_v38 = vld [vmem:[%s4756_s7 + $0x564] sm:$0xf0]  ;;  %v3613_v40 = vld [vmem:[%s4756_s7 + $0x5e0] sm:$0xf]  ;;  %v3422_v44 = vor.u32 %v4128_v33, %v3421_v32 }
  0x82   : > { %1999 = vmatpush.bf16.msrb.mxu1 %v3214_v24  ;;  %v4178_v24 = vld [vmem:[%s4756_s7 + $0x5f4] sm:$0xf0]  ;;  %v3477_v50 = vld [vmem:[%s4756_s7 + $0x4d0] sm:$0xf]  ;;  %v4124_v61 = vld [vmem:[%s4756_s7 + $0x444] sm:$0xf0] }
  0x83   : > { %2012 = vmatpush.bf16.msrb.mxu2 %v3278_v25  ;;  %v607_v25 = vunpack.c.l.b16 %v333_v10  ;;  %v4142_v52 = vld [vmem:[%s4756_s7 + $0x4d4] sm:$0xf0]  ;;  %v3605_v55 = vld [vmem:[%s4756_s7 + $0x5d0] sm:$0xf]  ;;  %v3469_v62 = vld [vmem:[%s4756_s7 + $0x4c0] sm:$0xf] }
  0x84   : > { %2025 = vmatpush.bf16.msrb.mxu3 %v3342_v29  ;;  %v608_v29 = vunpack.c.h.b16 %v333_v10  ;;  %v4158_v54 = vld [vmem:[%s4756_s7 + $0x554] sm:$0xf0]  ;;  %v3478_v58 = vor.u32 %v4142_v52, %v3477_v50  ;;  %v4156_v2 = vld [vmem:[%s4756_s7 + $0x544] sm:$0xf0]  ;;  %v3597_v3 = vld [vmem:[%s4756_s7 + $0x5c0] sm:$0xf] }
  0x85   : > { %1987 = vmatpush.bf16.msrb.mxu0 %v3142_v35  ;;  %v3622_v35 = vor.u32 %v4178_v24, %v3621_v23  ;;  %v4934_v42 = vpack.c.b16 %v607_v25, %v607_v25  ;;  %v4174_v56 = vld [vmem:[%s4756_s7 + $0x5d4] sm:$0xf0]  ;;  %v4172_v4 = vld [vmem:[%s4756_s7 + $0x5c4] sm:$0xf0]  ;;  %v3397_v10 = vld [vmem:[%s4756_s7 + $0x430] sm:$0xf] }
  0x86   : > { %2000 = vmatpush.bf16.msrb.mxu1 %v3206_v36  ;;  %v4144_v36 = vld [vmem:[%s4756_s7 + $0x4e4] sm:$0xf0]  ;;  %v4938_v45 = vpack.c.b16 %v608_v29, %v608_v29  ;;  %v3606_v63 = vor.u32 %v4174_v56, %v3605_v55  ;;  %v4122_v11 = vld [vmem:[%s4756_s7 + $0x434] sm:$0xf0]  ;;  %v3461_v12 = vld [vmem:[%s4756_s7 + $0x4b0] sm:$0xf]  ;;  %v3598_v13 = vor.u32 %v4172_v4, %v3597_v3 }
  0x87   : > { %2013 = vmatpush.bf16.msrb.mxu2 %v3270_v37  ;;  %v3549_v37 = vld [vmem:[%s4756_s7 + $0x560] sm:$0xf]  ;;  %v3486_v46 = vor.u32 %v4144_v36, %v3485_v34  ;;  %v3525_v15 = vld [vmem:[%s4756_s7 + $0x530] sm:$0xf]  ;;  %v4154_v16 = vld [vmem:[%s4756_s7 + $0x534] sm:$0xf0] }
  0x88   : > { %2026 = vmatpush.bf16.msrb.mxu3 %v3334_v41  ;;  %v4176_v41 = vld [vmem:[%s4756_s7 + $0x5e4] sm:$0xf0]  ;;  %v3589_v17 = vld [vmem:[%s4756_s7 + $0x5b0] sm:$0xf]  ;;  %v4170_v18 = vld [vmem:[%s4756_s7 + $0x5b4] sm:$0xf0]  ;;  %v3526_v23 = vor.u32 %v4154_v16, %v3525_v15 }
  0x89   : > { %1988 = vmatpush.bf16.msrb.mxu0 %v3134_v47  ;;  %v3550_v47 = vor.u32 %v4160_v38, %v3549_v37  ;;  %v3614_v51 = vor.u32 %v4176_v41, %v3613_v40  ;;  %v3389_v24 = vld [vmem:[%s4756_s7 + $0x420] sm:$0xf]  ;;  %v4120_v25 = vld [vmem:[%s4756_s7 + $0x424] sm:$0xf0]  ;;  %v3381_v36 = vld [vmem:[%s4756_s7 + $0x410] sm:$0xf] }
  0x8a   : > { %2001 = vmatpush.bf16.msrb.mxu1 %v3198_v48  ;;  %v3413_v48 = vld [vmem:[%s4756_s7 + $0x450] sm:$0xf]  ;;  %v3453_v26 = vld [vmem:[%s4756_s7 + $0x4a0] sm:$0xf]  ;;  %v4168_v32 = vld [vmem:[%s4756_s7 + $0x5a4] sm:$0xf0]  ;;  %v3390_v33 = vor.u32 %v4120_v25, %v3389_v24 }
  0x8b   : > { %2014 = vmatpush.bf16.msrb.mxu2 %v3262_v49  ;;  %v4126_v49 = vld [vmem:[%s4756_s7 + $0x454] sm:$0xf0]  ;;  %v3517_v29 = vld [vmem:[%s4756_s7 + $0x520] sm:$0xf]  ;;  %v3445_v38 = vld [vmem:[%s4756_s7 + $0x490] sm:$0xf] }
  0x8c   : > { %2027 = vmatpush.bf16.msrb.mxu3 %v3326_v53  ;;  %v3541_v53 = vld [vmem:[%s4756_s7 + $0x550] sm:$0xf]  ;;  %v3414_v57 = vor.u32 %v4126_v49, %v3413_v48  ;;  %v4118_v37 = vld [vmem:[%s4756_s7 + $0x414] sm:$0xf0]  ;;  %v3373_v49 = vld [vmem:[%s4756_s7 + $0x400] sm:$0xf] }
  0x8d   : > { %1989 = vmatpush.bf16.msrb.mxu0 %v3126_v60  ;;  %v3542_v59 = vor.u32 %v4158_v54, %v3541_v53  ;;  %v3405_v60 = vld [vmem:[%s4756_s7 + $0x440] sm:$0xf]  ;;  %v4134_v41 = vld [vmem:[%s4756_s7 + $0x494] sm:$0xf0]  ;;  %v3382_v50 = vor.u32 %v4118_v37, %v3381_v36  ;;  %v4132_v53 = vld [vmem:[%s4756_s7 + $0x484] sm:$0xf0] }
  0x8e   : > { %2002 = vmatpush.bf16.msrb.mxu1 %v3190_v0  ;;  %v4140_v0 = vld [vmem:[%s4756_s7 + $0x4c4] sm:$0xf0]  ;;  %v4166_v48 = vld [vmem:[%s4756_s7 + $0x594] sm:$0xf0]  ;;  %v3437_v52 = vld [vmem:[%s4756_s7 + $0x480] sm:$0xf]  ;;  %v3446_v54 = vor.u32 %v4134_v41, %v3445_v38 }
  0x8f   : > { %2015 = vmatpush.bf16.msrb.mxu2 %v3254_v1  ;;  %v3533_v1 = vld [vmem:[%s4756_s7 + $0x540] sm:$0xf]  ;;  %v3470_v8 = vor.u32 %v4140_v0, %v3469_v62  ;;  %v336_v62 = vld [vmem:[%s4749_s9 + $0x28] sm:$0xff]  ;;  %v4194_v0 = vld [vmem:[%s4756_s7 + $0x674] sm:$0xf0] }
  0x90   : > { %2028 = vmatpush.bf16.msrb.mxu3 %v3318_v6  ;;  %v3406_v6 = vor.u32 %v4124_v61, %v3405_v60  ;;  %v3534_v9 = vor.u32 %v4156_v2, %v3533_v1  ;;  %v3501_v56 = vld [vmem:[%s4756_s7 + $0x500] sm:$0xf]  ;;  %v4164_v61 = vld [vmem:[%s4756_s7 + $0x584] sm:$0xf0]  ;;  %v3749_v1 = vld [vmem:[%s4756_s7 + $0x6f0] sm:$0xf] }
  0x91   : > { %1990 = vmatpush.bf16.msrb.mxu0 %v3118_v14  ;;  %v4138_v14 = vld [vmem:[%s4756_s7 + $0x4b4] sm:$0xf0]  ;;  %v3565_v60 = vld [vmem:[%s4756_s7 + $0x580] sm:$0xf]  ;;  %v3813_v4 = vld [vmem:[%s4756_s7 + $0x770] sm:$0xf] }
  0x92   : > { %2003 = vmatpush.bf16.msrb.mxu1 %v3182_v19  ;;  %v3398_v19 = vor.u32 %v4122_v11, %v3397_v10  ;;  %v4210_v3 = vld [vmem:[%s4756_s7 + $0x6f4] sm:$0xf0]  ;;  %v3877_v11 = vld [vmem:[%s4756_s7 + $0x7f0] sm:$0xf]  ;;  %v3566_v15 = vor.u32 %v4164_v61, %v3565_v60  ;;  %v3741_v24 = vld [vmem:[%s4756_s7 + $0x6e0] sm:$0xf] }
  0x93   : > { %2016 = vmatpush.bf16.msrb.mxu2 %v3246_v20  ;;  %v3462_v20 = vor.u32 %v4138_v14, %v3461_v12  ;;  %v4242_v12 = vld [vmem:[%s4756_s7 + $0x7f4] sm:$0xf0]  ;;  %v3669_v38 = vld [vmem:[%s4756_s7 + $0x650] sm:$0xf]  ;;  %v4220_v60 = vld [vmem:[%s4756_s7 + $0x744] sm:$0xf0] }
  0x94   : > { %2029 = vmatpush.bf16.msrb.mxu3 %v3310_v27  ;;  %1991 = vmatmul.bf16.vlgmr.msrb.gmra.mxu0 %v4934_v42  ;;  %v3590_v27 = vor.u32 %v4170_v18, %v3589_v17  ;;  %v614_v17 = vunpack.c.h.b16 %v336_v62  ;;  %v3750_v18 = vor.u32 %v4210_v3, %v3749_v1  ;;  %v3878_v25 = vor.u32 %v4242_v12, %v3877_v11  ;;  %v3733_v41 = vld [vmem:[%s4756_s7 + $0x6d0] sm:$0xf]  ;;  %v3853_v61 = vld [vmem:[%s4756_s7 + $0x7c0] sm:$0xf]  ;;  %v4186_v3 = vld [vmem:[%s4756_s7 + $0x634] sm:$0xf0] }
  0x95   : > { %2035 = vmatpush.bf16.msra.mxu0 %v3430_v28  ;;  %2004 = vmatmul.bf16.vlgmr.msrb.gmra.mxu1 %v4938_v45  ;;  %v4136_v28 = vld [vmem:[%s4756_s7 + $0x4a4] sm:$0xf0]  ;;  %v3845_v11 = vld [vmem:[%s4756_s7 + $0x7b0] sm:$0xf]  ;;  %v4234_v12 = vld [vmem:[%s4756_s7 + $0x7b4] sm:$0xf0] }
  0x96   : > { %2048 = vmatpush.bf16.msra.mxu1 %v3494_v30  ;;  %2017 = vmatmul.bf16.vlgmr.msrb.gmra.mxu2 %v4930_v39  ;;  %v4152_v30 = vld [vmem:[%s4756_s7 + $0x524] sm:$0xf0]  ;;  %v3454_v34 = vor.u32 %v4136_v28, %v3453_v26  ;;  %v3805_v28 = vld [vmem:[%s4756_s7 + $0x760] sm:$0xf] }
  0x97   : > { %2061 = vmatpush.bf16.msra.mxu2 %v3558_v31  ;;  %2030 = vmatmul.bf16.vlgmr.msrb.gmra.mxu3 %v4936_v43  ;;  %v3581_v31 = vld [vmem:[%s4756_s7 + $0x5a0] sm:$0xf] }
  0x98   : > { %2074 = vmatpush.bf16.msra.mxu3 %v3622_v35  ;;  %v3518_v35 = vor.u32 %v4152_v30, %v3517_v29  ;;  %v3582_v40 = vor.u32 %v4168_v32, %v3581_v31  ;;  %v4224_v29 = vld [vmem:[%s4756_s7 + $0x764] sm:$0xf0]  ;;  %v3869_v32 = vld [vmem:[%s4756_s7 + $0x7e0] sm:$0xf] }
  0x99   : > { %2036 = vmatpush.bf16.msra.mxu0 %v3422_v44  ;;  %v3509_v44 = vld [vmem:[%s4756_s7 + $0x510] sm:$0xf]  ;;  %v3806_v37 = vor.u32 %v4224_v29, %v3805_v28 }
  0x9a   : > { %2049 = vmatpush.bf16.msra.mxu1 %v3486_v46  ;;  %v4150_v46 = vld [vmem:[%s4756_s7 + $0x514] sm:$0xf0] }
  0x9b   : > { %2062 = vmatpush.bf16.msra.mxu2 %v3550_v47  ;;  %v3573_v47 = vld [vmem:[%s4756_s7 + $0x590] sm:$0xf]  ;;  %v3510_v55 = vor.u32 %v4150_v46, %v3509_v44  ;;  %v4206_v46 = vld [vmem:[%s4756_s7 + $0x6d4] sm:$0xf0] }
  0x9c   : > { %2075 = vmatpush.bf16.msra.mxu3 %v3614_v51  ;;  %v4116_v51 = vld [vmem:[%s4756_s7 + $0x404] sm:$0xf0] }
  0x9d   : > { %2037 = vmatpush.bf16.msra.mxu0 %v3414_v57  ;;  %v4148_v57 = vld [vmem:[%s4756_s7 + $0x504] sm:$0xf0]  ;;  %v3374_v2 = vor.u32 %v4116_v51, %v3373_v49  ;;  %v3861_v49 = vld [vmem:[%s4756_s7 + $0x7d0] sm:$0xf] }
  0x9e   : > { %2050 = vmatpush.bf16.msra.mxu1 %v3478_v58  ;;  %v335_v58 = vld [vmem:[%s4749_s9 + $0x20] sm:$0xff]  ;;  %v3502_v10 = vor.u32 %v4148_v57, %v3501_v56 }
  0x9f   : > { %2063 = vmatpush.bf16.msra.mxu2 %v3542_v59  ;;  %v3574_v59 = vor.u32 %v4166_v48, %v3573_v47  ;;  %v612_v14 = vunpack.c.h.b16 %v335_v58  ;;  %v3797_v47 = vld [vmem:[%s4756_s7 + $0x750] sm:$0xf]  ;;  %v4222_v48 = vld [vmem:[%s4756_s7 + $0x754] sm:$0xf0]  ;;  %v3725_v56 = vld [vmem:[%s4756_s7 + $0x6c0] sm:$0xf] }
  0xa0   : > { %2076 = vmatpush.bf16.msra.mxu3 %v3606_v63  ;;  %v3685_v63 = vld [vmem:[%s4756_s7 + $0x670] sm:$0xf] }
  0xa1   : > { %2038 = vmatpush.bf16.msra.mxu0 %v3406_v6  ;;  %v4226_v6 = vld [vmem:[%s4756_s7 + $0x774] sm:$0xf0]  ;;  %v3686_v16 = vor.u32 %v4194_v0, %v3685_v63  ;;  %v5012_v31 = vpack.c.b16 %v612_v14, %v612_v14 }
  0xa2   : > { %2051 = vmatpush.bf16.msra.mxu1 %v3470_v8  ;;  %v611_v8 = vunpack.c.l.b16 %v335_v58  ;;  %v4204_v58 = vld [vmem:[%s4756_s7 + $0x6c4] sm:$0xf0] }
  0xa3   : > { %2064 = vmatpush.bf16.msra.mxu2 %v3534_v9  ;;  %v3438_v9 = vor.u32 %v4132_v53, %v3437_v52  ;;  %v3734_v52 = vor.u32 %v4206_v46, %v3733_v41  ;;  %v3798_v53 = vor.u32 %v4222_v48, %v3797_v47  ;;  %v3726_v0 = vor.u32 %v4204_v58, %v3725_v56  ;;  %v4214_v41 = vld [vmem:[%s4756_s7 + $0x714] sm:$0xf0]  ;;  %v3629_v47 = vld [vmem:[%s4756_s7 + $0x600] sm:$0xf]  ;;  %v337_v56 = vld [vmem:[%s4749_s9 + $0x30] sm:$0xff] }
  0xa4   : > { %2077 = vmatpush.bf16.msra.mxu3 %v3598_v13  ;;  %v613_v13 = vunpack.c.l.b16 %v336_v62  ;;  %v5005_v26 = vpack.c.b16 %v611_v8, %v611_v8  ;;  %v4236_v62 = vld [vmem:[%s4756_s7 + $0x7c4] sm:$0xf0]  ;;  %v4202_v8 = vld [vmem:[%s4756_s7 + $0x6b4] sm:$0xf0]  ;;  %v3821_v58 = vld [vmem:[%s4756_s7 + $0x780] sm:$0xf] }
  0xa5   : > { %2039 = vmatpush.bf16.msra.mxu0 %v3398_v19  ;;  %v3814_v19 = vor.u32 %v4226_v6, %v3813_v4  ;;  %v3717_v4 = vld [vmem:[%s4756_s7 + $0x6b0] sm:$0xf]  ;;  %v3854_v6 = vor.u32 %v4236_v62, %v3853_v61  ;;  %v4230_v46 = vld [vmem:[%s4756_s7 + $0x794] sm:$0xf0]  ;;  %v4001_v61 = vld [vmem:[%s4756_s7 + $0x74] sm:$0xf] }
  0xa6   : > { %2052 = vmatpush.bf16.msra.mxu1 %v3462_v20  ;;  %v3677_v20 = vld [vmem:[%s4756_s7 + $0x660] sm:$0xf]  ;;  %v5010_v30 = vpack.c.b16 %v613_v13, %v613_v13  ;;  %v3718_v14 = vor.u32 %v4202_v8, %v3717_v4  ;;  %v2919_v62 = vld [vmem:[%s4756_s7 + $0x78] sm:$0xf0]  ;;  %v615_v4 = vunpack.c.l.b16 %v337_v56 }
  0xa7   : > { %2065 = vmatpush.bf16.msra.mxu2 %v3526_v23  ;;  %v4192_v23 = vld [vmem:[%s4756_s7 + $0x664] sm:$0xf0] }
  0xa8   : > { %2078 = vmatpush.bf16.msra.mxu3 %v3590_v27  ;;  %v4208_v27 = vld [vmem:[%s4756_s7 + $0x6e4] sm:$0xf0] }
  0xa9   : > { %2040 = vmatpush.bf16.msra.mxu0 %v3390_v33  ;;  %v4240_v33 = vld [vmem:[%s4756_s7 + $0x7e4] sm:$0xf0]  ;;  %v3742_v36 = vor.u32 %v4208_v27, %v3741_v24 }
  0xaa   : > { %2053 = vmatpush.bf16.msra.mxu1 %v3454_v34  ;;  %v5016_v34 = vpack.c.b16 %v614_v17, %v614_v17  ;;  %v3870_v44 = vor.u32 %v4240_v33, %v3869_v32  ;;  %v4184_v17 = vld [vmem:[%s4756_s7 + $0x624] sm:$0xf0]  ;;  %v3637_v33 = vld [vmem:[%s4756_s7 + $0x610] sm:$0xf] }
  0xab   : > { %2066 = vmatpush.bf16.msra.mxu2 %v3518_v35  ;;  %v3678_v35 = vor.u32 %v4192_v23, %v3677_v20  ;;  %v4200_v20 = vld [vmem:[%s4756_s7 + $0x6a4] sm:$0xf0]  ;;  %v3773_v23 = vld [vmem:[%s4756_s7 + $0x720] sm:$0xf] }
  0xac   : > { %2079 = vmatpush.bf16.msra.mxu3 %v3582_v40  ;;  %v4190_v40 = vld [vmem:[%s4756_s7 + $0x654] sm:$0xf0]  ;;  %v4216_v24 = vld [vmem:[%s4756_s7 + $0x724] sm:$0xf0] }
  0xad   : > { %2041 = vmatpush.bf16.msra.mxu0 %v3382_v50  ;;  %v4238_v50 = vld [vmem:[%s4756_s7 + $0x7d4] sm:$0xf0]  ;;  %v3670_v51 = vor.u32 %v4190_v40, %v3669_v38  ;;  %v4232_v27 = vld [vmem:[%s4756_s7 + $0x7a4] sm:$0xf0]  ;;  %v3774_v32 = vor.u32 %v4216_v24, %v3773_v23  ;;  %v3765_v40 = vld [vmem:[%s4756_s7 + $0x710] sm:$0xf]  ;;  %v5083_v24 = vpack.c.b16 %v615_v4, %v615_v4 }
  0xae   : > { %2054 = vmatpush.bf16.msra.mxu1 %v3446_v54  ;;  %v3661_v54 = vld [vmem:[%s4756_s7 + $0x640] sm:$0xf]  ;;  %v3862_v57 = vor.u32 %v4238_v50, %v3861_v49  ;;  %v4198_v38 = vld [vmem:[%s4756_s7 + $0x694] sm:$0xf0]  ;;  %v4180_v49 = vld [vmem:[%s4756_s7 + $0x604] sm:$0xf0] }
  0xaf   : > { %2067 = vmatpush.bf16.msra.mxu2 %v3510_v55  ;;  %v4188_v55 = vld [vmem:[%s4756_s7 + $0x644] sm:$0xf0]  ;;  %v3693_v50 = vld [vmem:[%s4756_s7 + $0x680] sm:$0xf]  ;;  %v3993_v4 = vld [vmem:[%s4756_s7 + $0x34] sm:$0xf] }
  0xb0   : > { %2080 = vmatpush.bf16.msra.mxu3 %v3574_v59  ;;  %v3789_v59 = vld [vmem:[%s4756_s7 + $0x740] sm:$0xf]  ;;  %v3662_v63 = vor.u32 %v4188_v55, %v3661_v54  ;;  %v4212_v55 = vld [vmem:[%s4756_s7 + $0x704] sm:$0xf0] }
  0xb1   : > { %2042 = vmatpush.bf16.msra.mxu0 %v3374_v2  ;;  %v3790_v1 = vor.u32 %v4220_v60, %v3789_v59  ;;  %v3653_v2 = vld [vmem:[%s4756_s7 + $0x630] sm:$0xf]  ;;  %v3757_v54 = vld [vmem:[%s4756_s7 + $0x700] sm:$0xf]  ;;  %v4228_v59 = vld [vmem:[%s4756_s7 + $0x784] sm:$0xf0] }
  0xb2   : > { %2055 = vmatpush.bf16.msra.mxu1 %v3438_v9  ;;  %v3781_v9 = vld [vmem:[%s4756_s7 + $0x730] sm:$0xf]  ;;  %v3654_v13 = vor.u32 %v4186_v3, %v3653_v2  ;;  %v338_v60 = vld [vmem:[%s4749_s9 + $0x38] sm:$0xff]  ;;  %v4033_v2 = vld [vmem:[%s4756_s7 + $0x174] sm:$0xf]  ;;  %v3758_v8 = vor.u32 %v4212_v55, %v3757_v54 }
  0xb3   : > { %2068 = vmatpush.bf16.msra.mxu2 %v3502_v10  ;;  %v4218_v10 = vld [vmem:[%s4756_s7 + $0x734] sm:$0xf0]  ;;  %v3047_v3 = vld [vmem:[%s4756_s7 + $0x178] sm:$0xf0] }
  0xb4   : > { %2081 = vmatpush.bf16.msra.mxu3 %v3566_v15  ;;  %2043 = vmatmul.bf16.vlgmr.msra.gmra.mxu0 %v5005_v26  ;;  %v3782_v15 = vor.u32 %v4218_v10, %v3781_v9  ;;  %v4049_v9 = vld [vmem:[%s4756_s7 + $0x1f4] sm:$0xf]  ;;  %v3111_v10 = vld [vmem:[%s4756_s7 + $0x1f8] sm:$0xf0] }
  0xb5   : > { %2087 = vmatpush.bf16.msrb.mxu0 %v3686_v16  ;;  %2056 = vmatmul.bf16.vlgmr.msra.gmra.mxu1 %v5012_v31  ;;  %v3645_v16 = vld [vmem:[%s4756_s7 + $0x620] sm:$0xf]  ;;  %v3114_v23 = vor.u32 %v4049_v9, %v3111_v10  ;;  %v2951_v10 = vld [vmem:[%s4756_s7 + $0xb8] sm:$0xf0] }
  0xb6   : > { %2100 = vmatpush.bf16.msrb.mxu1 %v3750_v18  ;;  %2069 = vmatmul.bf16.vlgmr.msra.gmra.mxu2 %v5010_v30  ;;  %v3709_v18 = vld [vmem:[%s4756_s7 + $0x6a0] sm:$0xf]  ;;  %v3646_v28 = vor.u32 %v4184_v17, %v3645_v16  ;;  %v3050_v17 = vor.u32 %v4033_v2, %v3047_v3 }
  0xb7   : > { %2113 = vmatpush.bf16.msrb.mxu2 %v3814_v19  ;;  %2082 = vmatmul.bf16.vlgmr.msra.gmra.mxu3 %v5016_v34  ;;  %v3846_v19 = vor.u32 %v4234_v12, %v3845_v11  ;;  %v3710_v29 = vor.u32 %v4200_v20, %v3709_v18  ;;  %v617_v11 = vunpack.c.l.b16 %v338_v60  ;;  %v616_v12 = vunpack.c.h.b16 %v337_v56  ;;  %v3999_v18 = vld [vmem:[%s4756_s7 + $0x64] sm:$0xf] }
  0xb8   : > { %2126 = vmatpush.bf16.msrb.mxu3 %v3878_v25  ;;  %v3837_v25 = vld [vmem:[%s4756_s7 + $0x7a0] sm:$0xf]  ;;  %v4015_v20 = vld [vmem:[%s4756_s7 + $0xe4] sm:$0xf] }
  0xb9   : > { %2088 = vmatpush.bf16.msrb.mxu0 %v3678_v35  ;;  %v4182_v35 = vld [vmem:[%s4756_s7 + $0x614] sm:$0xf0]  ;;  %v3995_v56 = vld [vmem:[%s4756_s7 + $0x44] sm:$0xf] }
  0xba   : > { %2101 = vmatpush.bf16.msrb.mxu1 %v3742_v36  ;;  %v3701_v36 = vld [vmem:[%s4756_s7 + $0x690] sm:$0xf]  ;;  %v3638_v48 = vor.u32 %v4182_v35, %v3637_v33  ;;  %v4047_v33 = vld [vmem:[%s4756_s7 + $0x1e4] sm:$0xf]  ;;  %v3103_v35 = vld [vmem:[%s4756_s7 + $0x1e8] sm:$0xf0] }
  0xbb   : > { %2114 = vmatpush.bf16.msrb.mxu2 %v3806_v37  ;;  %v3838_v37 = vor.u32 %v4232_v27, %v3837_v25  ;;  %v2975_v25 = vld [vmem:[%s4756_s7 + $0xe8] sm:$0xf0]  ;;  %v4031_v27 = vld [vmem:[%s4756_s7 + $0x164] sm:$0xf] }
  0xbc   : > { %2127 = vmatpush.bf16.msrb.mxu3 %v3870_v44  ;;  %v3829_v44 = vld [vmem:[%s4756_s7 + $0x790] sm:$0xf] }
  0xbd   : > { %2089 = vmatpush.bf16.msrb.mxu0 %v3670_v51  ;;  %v4196_v51 = vld [vmem:[%s4756_s7 + $0x684] sm:$0xf0] }
  0xbe   : > { %2102 = vmatpush.bf16.msrb.mxu1 %v3734_v52  ;;  %v3702_v52 = vor.u32 %v4198_v38, %v3701_v36  ;;  %v2978_v38 = vor.u32 %v4015_v20, %v2975_v25  ;;  %v4007_v20 = vld [vmem:[%s4756_s7 + $0xa4] sm:$0xf]  ;;  %v2943_v25 = vld [vmem:[%s4756_s7 + $0xa8] sm:$0xf0] }
  0xbf   : > { %2115 = vmatpush.bf16.msrb.mxu2 %v3798_v53  ;;  %v3766_v53 = vor.u32 %v4214_v41, %v3765_v40  ;;  %v3997_v41 = vld [vmem:[%s4756_s7 + $0x54] sm:$0xf] }
  0xc0   : > { %2128 = vmatpush.bf16.msrb.mxu3 %v3862_v57  ;;  %v3830_v57 = vor.u32 %v4230_v46, %v3829_v44  ;;  %v2903_v44 = vld [vmem:[%s4756_s7 + $0x58] sm:$0xf0]  ;;  %v4013_v46 = vld [vmem:[%s4756_s7 + $0xd4] sm:$0xf] }
  0xc1   : > { %2090 = vmatpush.bf16.msrb.mxu0 %v3662_v63  ;;  %v4017_v63 = vld [vmem:[%s4756_s7 + $0xf4] sm:$0xf] }
  0xc2   : > { %2103 = vmatpush.bf16.msrb.mxu1 %v3726_v0  ;;  %v3630_v0 = vor.u32 %v4180_v49, %v3629_v47  ;;  %v3106_v47 = vor.u32 %v4047_v33, %v3103_v35  ;;  %v4029_v49 = vld [vmem:[%s4756_s7 + $0x154] sm:$0xf]  ;;  %v4039_v33 = vld [vmem:[%s4756_s7 + $0x1a4] sm:$0xf]  ;;  %v3071_v35 = vld [vmem:[%s4756_s7 + $0x1a8] sm:$0xf0] }
  0xc3   : > { %2116 = vmatpush.bf16.msrb.mxu2 %v3790_v1  ;;  %v2983_v1 = vld [vmem:[%s4756_s7 + $0xf8] sm:$0xf0] }
  0xc4   : > { %2129 = vmatpush.bf16.msrb.mxu3 %v3854_v6  ;;  %v3694_v6 = vor.u32 %v4196_v51, %v3693_v50  ;;  %v2986_v16 = vor.u32 %v4017_v63, %v2983_v1  ;;  %v3031_v50 = vld [vmem:[%s4756_s7 + $0x158] sm:$0xf0]  ;;  %v4045_v51 = vld [vmem:[%s4756_s7 + $0x1d4] sm:$0xf]  ;;  %v4043_v63 = vld [vmem:[%s4756_s7 + $0x1c4] sm:$0xf] }
  0xc5   : > { %2091 = vmatpush.bf16.msrb.mxu0 %v3654_v13  ;;  %v3822_v13 = vor.u32 %v4228_v59, %v3821_v58  ;;  %v3034_v55 = vor.u32 %v4029_v49, %v3031_v50  ;;  %v4011_v58 = vld [vmem:[%s4756_s7 + $0xc4] sm:$0xf]  ;;  %v4021_v49 = vld [vmem:[%s4756_s7 + $0x114] sm:$0xf]  ;;  %v2999_v50 = vld [vmem:[%s4756_s7 + $0x118] sm:$0xf0] }
  0xc6   : > { %2104 = vmatpush.bf16.msrb.mxu1 %v3718_v14  ;;  %v2922_v14 = vor.u32 %v4001_v61, %v2919_v62  ;;  %v4027_v61 = vld [vmem:[%s4756_s7 + $0x144] sm:$0xf]  ;;  %v3023_v62 = vld [vmem:[%s4756_s7 + $0x148] sm:$0xf0] }
  0xc7   : > { %2117 = vmatpush.bf16.msrb.mxu2 %v3782_v15  ;;  %v618_v15 = vunpack.c.h.b16 %v338_v60  ;;  %v2959_v60 = vld [vmem:[%s4756_s7 + $0xc8] sm:$0xf0]  ;;  %v3026_v3 = vor.u32 %v4027_v61, %v3023_v62 }
  0xc8   : > { %2130 = vmatpush.bf16.msrb.mxu3 %v3846_v19  ;;  %v2911_v19 = vld [vmem:[%s4756_s7 + $0x68] sm:$0xf0]  ;;  %v2962_v2 = vor.u32 %v4011_v58, %v2959_v60  ;;  %v4003_v58 = vld [vmem:[%s4756_s7 + $0x84] sm:$0xf] }
  0xc9   : > { %2092 = vmatpush.bf16.msrb.mxu0 %v3646_v28  ;;  %v3039_v28 = vld [vmem:[%s4756_s7 + $0x168] sm:$0xf0]  ;;  %v5094_v36 = vpack.c.b16 %v618_v15, %v618_v15  ;;  %v4019_v60 = vld [vmem:[%s4756_s7 + $0x104] sm:$0xf] }
  0xca   : > { %2105 = vmatpush.bf16.msrb.mxu1 %v3710_v29  ;;  %v5088_v29 = vpack.c.b16 %v617_v11, %v617_v11  ;;  %v3042_v40 = vor.u32 %v4031_v27, %v3039_v28  ;;  %v4025_v11 = vld [vmem:[%s4756_s7 + $0x134] sm:$0xf]  ;;  %v4023_v27 = vld [vmem:[%s4756_s7 + $0x124] sm:$0xf]  ;;  %v3007_v28 = vld [vmem:[%s4756_s7 + $0x128] sm:$0xf0] }
  0xcb   : > { %2118 = vmatpush.bf16.msrb.mxu2 %v3774_v32  ;;  %v5090_v32 = vpack.c.b16 %v616_v12, %v616_v12  ;;  %v3015_v12 = vld [vmem:[%s4756_s7 + $0x138] sm:$0xf0]  ;;  %v2991_v62 = vld [vmem:[%s4756_s7 + $0x108] sm:$0xf0] }
  0xcc   : > { %2131 = vmatpush.bf16.msrb.mxu3 %v3838_v37  ;;  %v2914_v37 = vor.u32 %v3999_v18, %v2911_v19  ;;  %v3991_v18 = vld [vmem:[%s4756_s7 + $0x24] sm:$0xf]  ;;  %v2879_v19 = vld [vmem:[%s4756_s7 + $0x28] sm:$0xf0] }
  0xcd   : > { %2093 = vmatpush.bf16.msrb.mxu0 %v3638_v48  ;;  %v2967_v48 = vld [vmem:[%s4756_s7 + $0xd8] sm:$0xf0] }
  0xce   : > { %2106 = vmatpush.bf16.msrb.mxu1 %v3702_v52  ;;  %v3095_v52 = vld [vmem:[%s4756_s7 + $0x1d8] sm:$0xf0]  ;;  %v2970_v54 = vor.u32 %v4013_v46, %v2967_v48  ;;  %v4005_v46 = vld [vmem:[%s4756_s7 + $0x94] sm:$0xf] }
  0xcf   : > { %2119 = vmatpush.bf16.msrb.mxu2 %v3766_v53  ;;  %v2906_v53 = vor.u32 %v3997_v41, %v2903_v44  ;;  %v3098_v59 = vor.u32 %v4045_v51, %v3095_v52  ;;  %v3989_v41 = vld [vmem:[%s4756_s7 + $0x14] sm:$0xf]  ;;  %v2871_v44 = vld [vmem:[%s4756_s7 + $0x18] sm:$0xf0] }
  0xd0   : > { %2132 = vmatpush.bf16.msrb.mxu3 %v3830_v57  ;;  %v2895_v57 = vld [vmem:[%s4756_s7 + $0x48] sm:$0xf0]  ;;  %v2935_v48 = vld [vmem:[%s4756_s7 + $0x98] sm:$0xf0]  ;;  %v4037_v51 = vld [vmem:[%s4756_s7 + $0x194] sm:$0xf] }
  0xd1   : > { %2094 = vmatpush.bf16.msrb.mxu0 %v3630_v0  ;;  %v3087_v0 = vld [vmem:[%s4756_s7 + $0x1c8] sm:$0xf0]  ;;  %v2898_v1 = vor.u32 %v3995_v56, %v2895_v57  ;;  %v3063_v52 = vld [vmem:[%s4756_s7 + $0x198] sm:$0xf0]  ;;  %v2938_v56 = vor.u32 %v4005_v46, %v2935_v48  ;;  %v3002_v57 = vor.u32 %v4021_v49, %v2999_v50  ;;  %v4077_v46 = vld [vmem:[%s4756_s7 + $0x2d4] sm:$0xf] }
  0xd2   : > { %2107 = vmatpush.bf16.msrb.mxu1 %v3694_v6  ;;  %v2887_v6 = vld [vmem:[%s4756_s7 + $0x38] sm:$0xf0]  ;;  %v3090_v9 = vor.u32 %v4043_v63, %v3087_v0  ;;  %v3066_v61 = vor.u32 %v4037_v51, %v3063_v52  ;;  %v4035_v63 = vld [vmem:[%s4756_s7 + $0x184] sm:$0xf]  ;;  %v3055_v0 = vld [vmem:[%s4756_s7 + $0x188] sm:$0xf0] }
  0xd3   : > { %2120 = vmatpush.bf16.msrb.mxu2 %v3758_v8  ;;  %v4009_v8 = vld [vmem:[%s4756_s7 + $0xb4] sm:$0xf]  ;;  %v2890_v15 = vor.u32 %v3993_v4, %v2887_v6  ;;  %v3239_v6 = vld [vmem:[%s4756_s7 + $0x2f8] sm:$0xf0] }
  0xd4   : > { %2133 = vmatpush.bf16.msrb.mxu3 %v3822_v13  ;;  %2095 = vmatmul.bf16.vlgmr.msrb.gmra.mxu0 %v5083_v24  ;;  %v4041_v13 = vld [vmem:[%s4756_s7 + $0x1b4] sm:$0xf]  ;;  %v3223_v48 = vld [vmem:[%s4756_s7 + $0x2d8] sm:$0xf0] }
  0xd5   : > { %2139 = vmatpush.bf16.msra.mxu0 %v2922_v14  ;;  %2108 = vmatmul.bf16.vlgmr.msrb.gmra.mxu1 %v5090_v32  ;;  %v3079_v14 = vld [vmem:[%s4756_s7 + $0x1b8] sm:$0xf0]  ;;  %v4093_v49 = vld [vmem:[%s4756_s7 + $0x354] sm:$0xf] }
  0xd6   : > { %2152 = vmatpush.bf16.msra.mxu1 %v2986_v16  ;;  %2121 = vmatmul.bf16.vlgmr.msrb.gmra.mxu2 %v5088_v29  ;;  %v2954_v16 = vor.u32 %v4009_v8, %v2951_v10  ;;  %v4097_v8 = vld [vmem:[%s4756_s7 + $0x374] sm:$0xf]  ;;  %v3287_v50 = vld [vmem:[%s4756_s7 + $0x358] sm:$0xf0] }
  0xd7   : > { %2165 = vmatpush.bf16.msra.mxu2 %v3050_v17  ;;  %2134 = vmatmul.bf16.vlgmr.msrb.gmra.mxu3 %v5094_v36  ;;  %v3018_v17 = vor.u32 %v4025_v11, %v3015_v12  ;;  %v2994_v11 = vor.u32 %v4019_v60, %v2991_v62  ;;  %v4113_v12 = vld [vmem:[%s4756_s7 + $0x3f4] sm:$0xf]  ;;  %v3351_v52 = vld [vmem:[%s4756_s7 + $0x3d8] sm:$0xf0]  ;;  %v4107_v60 = vld [vmem:[%s4756_s7 + $0x3c4] sm:$0xf] }
  0xd8   : > { %2178 = vmatpush.bf16.msra.mxu3 %v3114_v23  ;;  %v3082_v23 = vor.u32 %v4041_v13, %v3079_v14  ;;  %v3367_v13 = vld [vmem:[%s4756_s7 + $0x3f8] sm:$0xf0]  ;;  %v3058_v14 = vor.u32 %v4035_v63, %v3055_v0  ;;  %v4109_v51 = vld [vmem:[%s4756_s7 + $0x3d4] sm:$0xf] }
  0xd9   : > { %2140 = vmatpush.bf16.msra.mxu0 %v2914_v37  ;;  %v2882_v37 = vor.u32 %v3991_v18, %v2879_v19  ;;  %v4063_v18 = vld [vmem:[%s4756_s7 + $0x264] sm:$0xf]  ;;  %v3167_v19 = vld [vmem:[%s4756_s7 + $0x268] sm:$0xf0]  ;;  %v4057_v0 = vld [vmem:[%s4756_s7 + $0x234] sm:$0xf] }
  0xda   : > { %2153 = vmatpush.bf16.msra.mxu1 %v2978_v38  ;;  %v2946_v38 = vor.u32 %v4007_v20, %v2943_v25  ;;  %v4079_v20 = vld [vmem:[%s4756_s7 + $0x2e4] sm:$0xf]  ;;  %v3231_v25 = vld [vmem:[%s4756_s7 + $0x2e8] sm:$0xf0] }
  0xdb   : > { %2166 = vmatpush.bf16.msra.mxu2 %v3042_v40  ;;  %v3010_v40 = vor.u32 %v4023_v27, %v3007_v28  ;;  %v4095_v27 = vld [vmem:[%s4756_s7 + $0x364] sm:$0xf]  ;;  %v3295_v28 = vld [vmem:[%s4756_s7 + $0x368] sm:$0xf0] }
  0xdc   : > { %2179 = vmatpush.bf16.msra.mxu3 %v3106_v47  ;;  %v3074_v47 = vor.u32 %v4039_v33, %v3071_v35  ;;  %v4111_v33 = vld [vmem:[%s4756_s7 + $0x3e4] sm:$0xf]  ;;  %v3359_v35 = vld [vmem:[%s4756_s7 + $0x3e8] sm:$0xf0] }
  0xdd   : > { %2141 = vmatpush.bf16.msra.mxu0 %v2906_v53  ;;  %v2874_v53 = vor.u32 %v3989_v41, %v2871_v44  ;;  %v4061_v41 = vld [vmem:[%s4756_s7 + $0x254] sm:$0xf]  ;;  %v3159_v44 = vld [vmem:[%s4756_s7 + $0x258] sm:$0xf0] }
  0xde   : > { %2154 = vmatpush.bf16.msra.mxu1 %v2970_v54  ;;  %v3987_v54 = vld [vmem:[%s4756_s7 + $0x4] sm:$0xf] }
  0xdf   : > { %2167 = vmatpush.bf16.msra.mxu2 %v3034_v55  ;;  %v2863_v55 = vld [vmem:[%s4756_s7 + $0x8] sm:$0xf0] }
  0xe0   : > { %2180 = vmatpush.bf16.msra.mxu3 %v3098_v59  ;;  %v2927_v59 = vld [vmem:[%s4756_s7 + $0x88] sm:$0xf0]  ;;  %v2866_v4 = vor.u32 %v3987_v54, %v2863_v55  ;;  %v3226_v54 = vor.u32 %v4077_v46, %v3223_v48  ;;  %v3290_v55 = vor.u32 %v4093_v49, %v3287_v50  ;;  %v4085_v48 = vld [vmem:[%s4756_s7 + $0x314] sm:$0xf]  ;;  %v3255_v49 = vld [vmem:[%s4756_s7 + $0x318] sm:$0xf0] }
  0xe1   : > { %2142 = vmatpush.bf16.msra.mxu0 %v2898_v1  ;;  %v4065_v1 = vld [vmem:[%s4756_s7 + $0x274] sm:$0xf]  ;;  %v2930_v10 = vor.u32 %v4003_v58, %v2927_v59  ;;  %v3215_v58 = vld [vmem:[%s4756_s7 + $0x2c8] sm:$0xf0] }
  0xe2   : > { %2155 = vmatpush.bf16.msra.mxu1 %v2962_v2  ;;  %v3175_v2 = vld [vmem:[%s4756_s7 + $0x278] sm:$0xf0]  ;;  %v3279_v59 = vld [vmem:[%s4756_s7 + $0x348] sm:$0xf0] }
  0xe3   : > { %2168 = vmatpush.bf16.msra.mxu2 %v3026_v3  ;;  %v4081_v3 = vld [vmem:[%s4756_s7 + $0x2f4] sm:$0xf] }
  0xe4   : > { %2181 = vmatpush.bf16.msra.mxu3 %v3090_v9  ;;  %v3303_v9 = vld [vmem:[%s4756_s7 + $0x378] sm:$0xf0] }
  0xe5   : > { %2143 = vmatpush.bf16.msra.mxu0 %v2890_v15  ;;  %v3178_v15 = vor.u32 %v4065_v1, %v3175_v2  ;;  %v3143_v1 = vld [vmem:[%s4756_s7 + $0x238] sm:$0xf0]  ;;  %v4073_v2 = vld [vmem:[%s4756_s7 + $0x2b4] sm:$0xf] }
  0xe6   : > { %2156 = vmatpush.bf16.msra.mxu1 %v2954_v16  ;;  %v3242_v16 = vor.u32 %v4081_v3, %v3239_v6  ;;  %v4089_v6 = vld [vmem:[%s4756_s7 + $0x334] sm:$0xf] }
  0xe7   : > { %2169 = vmatpush.bf16.msra.mxu2 %v3018_v17  ;;  %v3306_v17 = vor.u32 %v4097_v8, %v3303_v9  ;;  %v3271_v8 = vld [vmem:[%s4756_s7 + $0x338] sm:$0xf0]  ;;  %v4105_v9 = vld [vmem:[%s4756_s7 + $0x3b4] sm:$0xf] }
  0xe8   : > { %2182 = vmatpush.bf16.msra.mxu3 %v3082_v23  ;;  %v3370_v23 = vor.u32 %v4113_v12, %v3367_v13  ;;  %v3274_v13 = vor.u32 %v4089_v6, %v3271_v8 }
  0xe9   : > { %2144 = vmatpush.bf16.msra.mxu0 %v2882_v37  ;;  %v3170_v37 = vor.u32 %v4063_v18, %v3167_v19  ;;  %v3199_v18 = vld [vmem:[%s4756_s7 + $0x2a8] sm:$0xf0]  ;;  %v4087_v19 = vld [vmem:[%s4756_s7 + $0x324] sm:$0xf] }
  0xea   : > { %2157 = vmatpush.bf16.msra.mxu1 %v2946_v38  ;;  %v3234_v38 = vor.u32 %v4079_v20, %v3231_v25  ;;  %v3263_v20 = vld [vmem:[%s4756_s7 + $0x328] sm:$0xf0] }
  0xeb   : > { %2170 = vmatpush.bf16.msra.mxu2 %v3010_v40  ;;  %v3298_v40 = vor.u32 %v4095_v27, %v3295_v28  ;;  %v3327_v25 = vld [vmem:[%s4756_s7 + $0x3a8] sm:$0xf0] }
  0xec   : > { %2183 = vmatpush.bf16.msra.mxu3 %v3074_v47  ;;  %v3362_v47 = vor.u32 %v4111_v33, %v3359_v35 }
  0xed   : > { %2145 = vmatpush.bf16.msra.mxu0 %v2874_v53  ;;  %v3162_v53 = vor.u32 %v4061_v41, %v3159_v44  ;;  %v4069_v41 = vld [vmem:[%s4756_s7 + $0x294] sm:$0xf] }
  0xee   : > { %2158 = vmatpush.bf16.msra.mxu1 %v2938_v56  ;;  %v3151_v56 = vld [vmem:[%s4756_s7 + $0x248] sm:$0xf0] }
  0xef   : > { %2171 = vmatpush.bf16.msra.mxu2 %v3002_v57  ;;  %v4075_v57 = vld [vmem:[%s4756_s7 + $0x2c4] sm:$0xf] }
  0xf0   : > { %2184 = vmatpush.bf16.msra.mxu3 %v3066_v61  ;;  %v3218_v62 = vor.u32 %v4075_v57, %v3215_v58  ;;  %v4067_v57 = vld [vmem:[%s4756_s7 + $0x284] sm:$0xf] }
  0xf1   : > { %2146 = vmatpush.bf16.msra.mxu0 %v2866_v4  ;;  %v3207_v4 = vld [vmem:[%s4756_s7 + $0x2b8] sm:$0xf0]  ;;  %v5200_v27 = vpop.f32.mrf.mxu0  ;;  %v4083_v58 = vld [vmem:[%s4756_s7 + $0x304] sm:$0xf] }
  0xf2   : > { %2159 = vmatpush.bf16.msra.mxu1 %v2930_v10  ;;  %v3335_v10 = vld [vmem:[%s4756_s7 + $0x3b8] sm:$0xf0]  ;;  %v3210_v12 = vor.u32 %v4073_v2, %v3207_v4  ;;  %v5202_v33 = vpop.f32.mrf.mxu1 }
  0xf3   : > { %2172 = vmatpush.bf16.msra.mxu2 %v2994_v11  ;;  %v3146_v11 = vor.u32 %v4057_v0, %v3143_v1  ;;  %v3495_v2 = vld [vmem:[%s4756_s7 + $0x4f8] sm:$0xf0] }
  0xf4   : > { %2185 = vmatpush.bf16.msra.mxu3 %v3058_v14  ;;  %2147 = vmatmul.bf16.vlgmr.msra.gmra.mxu0 %v4875_v21  ;;  %v3354_v21 = vor.u32 %v4109_v51, %v3351_v52  ;;  %v4055_v14 = vld [vmem:[%s4756_s7 + $0x224] sm:$0xf]  ;;  %v4101_v51 = vld [vmem:[%s4756_s7 + $0x394] sm:$0xf]  ;;  %v3319_v52 = vld [vmem:[%s4756_s7 + $0x398] sm:$0xf0] }
  0xf5   : > { %2191 = vmatpush.bf16.msrb.mxu0 %v3178_v15  ;;  %2160 = vmatmul.bf16.vlgmr.msra.gmra.mxu1 %v4878_v22  ;;  %v3343_v22 = vld [vmem:[%s4756_s7 + $0x3c8] sm:$0xf0]  ;;  %v3559_v4 = vld [vmem:[%s4756_s7 + $0x578] sm:$0xf0] }
  0xf6   : > { %2204 = vmatpush.bf16.msrb.mxu1 %v3242_v16  ;;  %2173 = vmatmul.bf16.vlgmr.msra.gmra.mxu2 %v4861_v5  ;;  %v4059_v5 = vld [vmem:[%s4756_s7 + $0x244] sm:$0xf]  ;;  %v3346_v3 = vor.u32 %v4107_v60, %v3343_v22  ;;  %v3135_v15 = vld [vmem:[%s4756_s7 + $0x228] sm:$0xf0] }
  0xf7   : > { %2217 = vmatpush.bf16.msrb.mxu2 %v3306_v17  ;;  %2186 = vmatmul.bf16.vlgmr.msra.gmra.mxu3 %v4864_v7  ;;  %v4091_v7 = vld [vmem:[%s4756_s7 + $0x344] sm:$0xf]  ;;  %v3154_v61 = vor.u32 %v4059_v5, %v3151_v56  ;;  %v3338_v17 = vor.u32 %v4105_v9, %v3335_v10  ;;  %v3138_v28 = vor.u32 %v4055_v14, %v3135_v15  ;;  %v3311_v22 = vld [vmem:[%s4756_s7 + $0x388] sm:$0xf0]  ;;  %v4177_v10 = vld [vmem:[%s4756_s7 + $0x5f4] sm:$0xf] }
  0xf8   : > { %2230 = vmatpush.bf16.msrb.mxu3 %v3370_v23  ;;  %v3282_v63 = vor.u32 %v4091_v7, %v3279_v59  ;;  %v4071_v16 = vld [vmem:[%s4756_s7 + $0x2a4] sm:$0xf]  ;;  %v3258_v56 = vor.u32 %v4085_v48, %v3255_v49  ;;  %v3322_v7 = vor.u32 %v4101_v51, %v3319_v52  ;;  %v3247_v59 = vld [vmem:[%s4756_s7 + $0x308] sm:$0xf0]  ;;  %v3415_v48 = vld [vmem:[%s4756_s7 + $0x458] sm:$0xf0] }
  0xf9   : > { %2192 = vmatpush.bf16.msrb.mxu0 %v3170_v37  ;;  %v4103_v23 = vld [vmem:[%s4756_s7 + $0x3a4] sm:$0xf]  ;;  %v3202_v35 = vor.u32 %v4071_v16, %v3199_v18  ;;  %v3266_v37 = vor.u32 %v4087_v19, %v3263_v20  ;;  %v5207_v44 = vpop.f32.mrf.mxu2  ;;  %v1942_v0 = vpop.f32.mrf.mxu0  ;;  %v3250_v9 = vor.u32 %v4083_v58, %v3247_v59  ;;  %v3423_v19 = vld [vmem:[%s4756_s7 + $0x468] sm:$0xf0]  ;;  %v4141_v49 = vld [vmem:[%s4756_s7 + $0x4d4] sm:$0xf] }
  0xfa   : > { %2205 = vmatpush.bf16.msrb.mxu1 %v3234_v38  ;;  %v4053_v38 = vld [vmem:[%s4756_s7 + $0x214] sm:$0xf]  ;;  %v3330_v46 = vor.u32 %v4103_v23, %v3327_v25  ;;  %v5212_v50 = vpop.f32.mrf.mxu3  ;;  %v4099_v60 = vld [vmem:[%s4756_s7 + $0x384] sm:$0xf]  ;;  %v1955_v6 = vpop.f32.mrf.mxu1  ;;  %v3487_v25 = vld [vmem:[%s4756_s7 + $0x4e8] sm:$0xf0] }
  0xfb   : > { %2218 = vmatpush.bf16.msrb.mxu2 %v3298_v40  ;;  %v3127_v40 = vld [vmem:[%s4756_s7 + $0x218] sm:$0xf0]  ;;  %v4127_v18 = vld [vmem:[%s4756_s7 + $0x464] sm:$0xf]  ;;  %v3407_v58 = vld [vmem:[%s4756_s7 + $0x448] sm:$0xf0] }
  0xfc   : > { %2231 = vmatpush.bf16.msrb.mxu3 %v3362_v47  ;;  %v3191_v47 = vld [vmem:[%s4756_s7 + $0x298] sm:$0xf0]  ;;  %v4143_v20 = vld [vmem:[%s4756_s7 + $0x4e4] sm:$0xf] }
  0xfd   : > { %2193 = vmatpush.bf16.msrb.mxu0 %v3162_v53  ;;  %v3130_v53 = vor.u32 %v4053_v38, %v3127_v40  ;;  %v3194_v5 = vor.u32 %v4069_v41, %v3191_v47  ;;  %v3615_v38 = vld [vmem:[%s4756_s7 + $0x5e8] sm:$0xf0]  ;;  %v3426_v40 = vor.u32 %v4127_v18, %v3423_v19  ;;  %v3490_v41 = vor.u32 %v4143_v20, %v3487_v25  ;;  %v4125_v47 = vld [vmem:[%s4756_s7 + $0x454] sm:$0xf]  ;;  %v3479_v52 = vld [vmem:[%s4756_s7 + $0x4d8] sm:$0xf0] }
  0xfe   : > { %2206 = vmatpush.bf16.msrb.mxu1 %v3226_v54  ;;  %v4051_v54 = vld [vmem:[%s4756_s7 + $0x204] sm:$0xf] }
  0xff   : > { %2219 = vmatpush.bf16.msrb.mxu2 %v3290_v55  ;;  %v3119_v55 = vld [vmem:[%s4756_s7 + $0x208] sm:$0xf0]  ;;  %v4155_v59 = vld [vmem:[%s4756_s7 + $0x544] sm:$0xf] }
 0x100   : > { %2232 = vmatpush.bf16.msrb.mxu3 %v3354_v21  ;;  %v3183_v21 = vld [vmem:[%s4756_s7 + $0x288] sm:$0xf0]  ;;  %v3122_v1 = vor.u32 %v4051_v54, %v3119_v55  ;;  %v3543_v54 = vld [vmem:[%s4756_s7 + $0x558] sm:$0xf0]  ;;  %v4173_v55 = vld [vmem:[%s4756_s7 + $0x5d4] sm:$0xf] }
 0x101   : > { %2194 = vmatpush.bf16.msrb.mxu0 %v3154_v61  ;;  %v4129_v61 = vld [vmem:[%s4756_s7 + $0x474] sm:$0xf]  ;;  %v3186_v8 = vor.u32 %v4067_v57, %v3183_v21  ;;  %v4123_v21 = vld [vmem:[%s4756_s7 + $0x444] sm:$0xf] }
 0x102   : > { %2207 = vmatpush.bf16.msrb.mxu1 %v3218_v62  ;;  %v3431_v62 = vld [vmem:[%s4756_s7 + $0x478] sm:$0xf0]  ;;  %v1981_v15 = vpop.f32.mrf.mxu3  ;;  %v4135_v18 = vld [vmem:[%s4756_s7 + $0x4a4] sm:$0xf] }
 0x103   : > { %2220 = vmatpush.bf16.msrb.mxu2 %v3282_v63  ;;  %v4145_v63 = vld [vmem:[%s4756_s7 + $0x4f4] sm:$0xf]  ;;  %v3434_v14 = vor.u32 %v4129_v61, %v3431_v62  ;;  %v3599_v61 = vld [vmem:[%s4756_s7 + $0x5c8] sm:$0xf0]  ;;  %v4151_v25 = vld [vmem:[%s4756_s7 + $0x524] sm:$0xf] }
 0x104   : > { %2233 = vmatpush.bf16.msrb.mxu3 %v3346_v3  ;;  %v4161_v3 = vld [vmem:[%s4756_s7 + $0x574] sm:$0xf]  ;;  %v3498_v16 = vor.u32 %v4145_v63, %v3495_v2  ;;  %v3399_v2 = vld [vmem:[%s4756_s7 + $0x438] sm:$0xf0] }
 0x105   : > { %2195 = vmatpush.bf16.msrb.mxu0 %v3146_v11  ;;  %v3623_v11 = vld [vmem:[%s4756_s7 + $0x5f8] sm:$0xf0] }
 0x106   : > { %2208 = vmatpush.bf16.msrb.mxu1 %v3210_v12  ;;  %v1968_v12 = vpop.f32.mrf.mxu2  ;;  %v3626_v23 = vor.u32 %v4177_v10, %v3623_v11  ;;  %v3527_v10 = vld [vmem:[%s4756_s7 + $0x538] sm:$0xf0]  ;;  %v4169_v11 = vld [vmem:[%s4756_s7 + $0x5b4] sm:$0xf] }
 0x107   : > { %2221 = vmatpush.bf16.msrb.mxu2 %v3274_v13  ;;  %v3314_v13 = vor.u32 %v4099_v60, %v3311_v22  ;;  %v3535_v60 = vld [vmem:[%s4756_s7 + $0x548] sm:$0xf0]  ;;  %v4171_v22 = vld [vmem:[%s4756_s7 + $0x5c4] sm:$0xf]  ;;  %v3591_v12 = vld [vmem:[%s4756_s7 + $0x5b8] sm:$0xf0] }
 0x108   : > { %2234 = vmatpush.bf16.msrb.mxu3 %v3338_v17  ;;  %v3562_v17 = vor.u32 %v4161_v3, %v3559_v4  ;;  %v3538_v0 = vor.u32 %v4155_v59, %v3535_v60  ;;  %v4137_v3 = vld [vmem:[%s4756_s7 + $0x4b4] sm:$0xf]  ;;  %v3602_v6 = vor.u32 %v4171_v22, %v3599_v61  ;;  %v3594_v20 = vor.u32 %v4169_v11, %v3591_v12  ;;  %v3439_v59 = vld [vmem:[%s4756_s7 + $0x488] sm:$0xf0]  ;;  %v4147_v60 = vld [vmem:[%s4756_s7 + $0x504] sm:$0xf] }
 0x109   : > { %2196 = vmatpush.bf16.msrb.mxu0 %v3138_v28  ;;  %v4159_v28 = vld [vmem:[%s4756_s7 + $0x564] sm:$0xf]  ;;  %v3815_v11 = vld [vmem:[%s4756_s7 + $0x778] sm:$0xf0] }
 0x10a   : > { %2209 = vmatpush.bf16.msrb.mxu1 %v3202_v35  ;;  %v3551_v35 = vld [vmem:[%s4756_s7 + $0x568] sm:$0xf0] }
 0x10b   : > { %2222 = vmatpush.bf16.msrb.mxu2 %v3266_v37  ;;  %v4175_v37 = vld [vmem:[%s4756_s7 + $0x5e4] sm:$0xf] }
 0x10c   : > { %2235 = vmatpush.bf16.msrb.mxu3 %v3330_v46  ;;  %v3554_v46 = vor.u32 %v4159_v28, %v3551_v35  ;;  %v3618_v51 = vor.u32 %v4175_v37, %v3615_v38  ;;  %v3519_v28 = vld [vmem:[%s4756_s7 + $0x528] sm:$0xf0]  ;;  %v4167_v37 = vld [vmem:[%s4756_s7 + $0x5a4] sm:$0xf] }
 0x10d   : > { %2197 = vmatpush.bf16.msrb.mxu0 %v3130_v53  ;;  %v4157_v53 = vld [vmem:[%s4756_s7 + $0x554] sm:$0xf]  ;;  %v3583_v38 = vld [vmem:[%s4756_s7 + $0x5a8] sm:$0xf0] }
 0x10e   : > { %2210 = vmatpush.bf16.msrb.mxu1 %v3194_v5  ;;  %v3607_v5 = vld [vmem:[%s4756_s7 + $0x5d8] sm:$0xf0]  ;;  %v3546_v57 = vor.u32 %v4157_v53, %v3543_v54  ;;  %v3586_v53 = vor.u32 %v4167_v37, %v3583_v38  ;;  %v3743_v38 = vld [vmem:[%s4756_s7 + $0x6e8] sm:$0xf0] }
 0x10f   : > { %2223 = vmatpush.bf16.msrb.mxu2 %v3258_v56  ;;  %v3418_v56 = vor.u32 %v4125_v47, %v3415_v48  ;;  %v3522_v47 = vor.u32 %v4151_v25, %v3519_v28  ;;  %v4117_v48 = vld [vmem:[%s4756_s7 + $0x414] sm:$0xf]  ;;  %v3447_v54 = vld [vmem:[%s4756_s7 + $0x498] sm:$0xf0]  ;;  %v3679_v25 = vld [vmem:[%s4756_s7 + $0x668] sm:$0xf0] }
 0x110   : > { %2236 = vmatpush.bf16.msrb.mxu3 %v3322_v7  ;;  %v3471_v7 = vld [vmem:[%s4756_s7 + $0x4c8] sm:$0xf0]  ;;  %v4207_v28 = vld [vmem:[%s4756_s7 + $0x6e4] sm:$0xf] }
 0x111   : > { %2198 = vmatpush.bf16.msrb.mxu0 %v3122_v1  ;;  %v5260_v62 = vpop.f32.mrf.mxu0  ;;  %v4121_v1 = vld [vmem:[%s4756_s7 + $0x434] sm:$0xf] }
 0x112   : > { %2211 = vmatpush.bf16.msrb.mxu1 %v3186_v8  ;;  %v5265_v4 = vpop.f32.mrf.mxu1  ;;  %v3463_v8 = vld [vmem:[%s4756_s7 + $0x4b8] sm:$0xf0] }
 0x113   : > { %2224 = vmatpush.bf16.msrb.mxu2 %v3250_v9  ;;  %v4153_v9 = vld [vmem:[%s4756_s7 + $0x534] sm:$0xf] }
 0x114   : > { %2237 = vmatpush.bf16.msrb.mxu3 %v3314_v13  ;;  %2199 = vmatmul.bf16.vlgmr.msrb.gmra.mxu0 %v4934_v42  ;;  %v4139_v42 = vld [vmem:[%s4756_s7 + $0x4c4] sm:$0xf]  ;;  %v3402_v13 = vor.u32 %v4121_v1, %v3399_v2  ;;  %v3530_v15 = vor.u32 %v4153_v9, %v3527_v10  ;;  %v4193_v2 = vld [vmem:[%s4756_s7 + $0x674] sm:$0xf]  ;;  %v3751_v9 = vld [vmem:[%s4756_s7 + $0x6f8] sm:$0xf0] }
 0x115   : > { %2243 = vmatpush.bf16.msra.mxu0 %v3434_v14  ;;  %2212 = vmatmul.bf16.vlgmr.msrb.gmra.mxu1 %v4938_v45  ;;  %v3410_v45 = vor.u32 %v4123_v21, %v3407_v58  ;;  %v3474_v63 = vor.u32 %v4139_v42, %v3471_v7  ;;  %v3466_v14 = vor.u32 %v4137_v3, %v3463_v8  ;;  %v4115_v21 = vld [vmem:[%s4756_s7 + $0x404] sm:$0xf]  ;;  %v3375_v58 = vld [vmem:[%s4756_s7 + $0x408] sm:$0xf0]  ;;  %v3687_v3 = vld [vmem:[%s4756_s7 + $0x678] sm:$0xf0] }
 0x116   : > { %2256 = vmatpush.bf16.msra.mxu1 %v3498_v16  ;;  %2225 = vmatmul.bf16.vlgmr.msrb.gmra.mxu2 %v4930_v39  ;;  %v3482_v39 = vor.u32 %v4141_v49, %v3479_v52  ;;  %v4119_v16 = vld [vmem:[%s4756_s7 + $0x424] sm:$0xf]  ;;  %v3383_v49 = vld [vmem:[%s4756_s7 + $0x418] sm:$0xf0]  ;;  %v3378_v8 = vor.u32 %v4115_v21, %v3375_v58  ;;  %v4225_v10 = vld [vmem:[%s4756_s7 + $0x774] sm:$0xf] }
 0x117   : > { %2269 = vmatpush.bf16.msra.mxu2 %v3562_v17  ;;  %2238 = vmatmul.bf16.vlgmr.msrb.gmra.mxu3 %v4936_v43  ;;  %v3610_v43 = vor.u32 %v4173_v55, %v3607_v5  ;;  %v3391_v17 = vld [vmem:[%s4756_s7 + $0x428] sm:$0xf0]  ;;  %v4149_v55 = vld [vmem:[%s4756_s7 + $0x514] sm:$0xf]  ;;  %v3511_v5 = vld [vmem:[%s4756_s7 + $0x518] sm:$0xf0] }
 0x118   : > { %2282 = vmatpush.bf16.msra.mxu3 %v3626_v23  ;;  %v3455_v23 = vld [vmem:[%s4756_s7 + $0x4a8] sm:$0xf0]  ;;  %v4131_v7 = vld [vmem:[%s4756_s7 + $0x484] sm:$0xf] }
 0x119   : > { %2244 = vmatpush.bf16.msra.mxu0 %v3426_v40  ;;  %v5275_v19 = vpop.f32.mrf.mxu2  ;;  %v3394_v40 = vor.u32 %v4119_v16, %v3391_v17  ;;  %v3442_v12 = vor.u32 %v4131_v7, %v3439_v59  ;;  %v3690_v17 = vor.u32 %v4193_v2, %v3687_v3  ;;  %v3727_v59 = vld [vmem:[%s4756_s7 + $0x6c8] sm:$0xf0]  ;;  %v4185_v3 = vld [vmem:[%s4756_s7 + $0x634] sm:$0xf] }
 0x11a   : > { %2257 = vmatpush.bf16.msra.mxu1 %v3490_v41  ;;  %v5280_v35 = vpop.f32.mrf.mxu3  ;;  %v1994_v41 = vpop.f32.mrf.mxu0 }
 0x11b   : > { %2270 = vmatpush.bf16.msra.mxu2 %v3554_v46  ;;  %v3458_v46 = vor.u32 %v4135_v18, %v3455_v23  ;;  %v2007_v52 = vpop.f32.mrf.mxu1  ;;  %v4191_v23 = vld [vmem:[%s4756_s7 + $0x664] sm:$0xf]  ;;  %v3807_v41 = vld [vmem:[%s4756_s7 + $0x768] sm:$0xf0] }
 0x11c   : > { %2283 = vmatpush.bf16.msra.mxu3 %v3618_v51  ;;  %v4133_v51 = vld [vmem:[%s4756_s7 + $0x494] sm:$0xf] }
 0x11d   : > { %2245 = vmatpush.bf16.msra.mxu0 %v3418_v56  ;;  %v4165_v56 = vld [vmem:[%s4756_s7 + $0x594] sm:$0xf]  ;;  %v3450_v42 = vor.u32 %v4133_v51, %v3447_v54  ;;  %v3746_v51 = vor.u32 %v4207_v28, %v3743_v38  ;;  %v3671_v54 = vld [vmem:[%s4756_s7 + $0x658] sm:$0xf0]  ;;  %v4215_v38 = vld [vmem:[%s4756_s7 + $0x724] sm:$0xf] }
 0x11e   : > { %2258 = vmatpush.bf16.msra.mxu1 %v3482_v39  ;;  %v3575_v39 = vld [vmem:[%s4756_s7 + $0x598] sm:$0xf0] }
 0x11f   : > { %2271 = vmatpush.bf16.msra.mxu2 %v3546_v57  ;;  %v3386_v57 = vor.u32 %v4117_v48, %v3383_v49  ;;  %v3578_v61 = vor.u32 %v4165_v56, %v3575_v39  ;;  %v3682_v48 = vor.u32 %v4191_v23, %v3679_v25  ;;  %v1954_v49 = vadd.f32 %v5202_v33, %v5200_v27  ;;  %v3735_v56 = vld [vmem:[%s4756_s7 + $0x6d8] sm:$0xf0]  ;;  %v4221_v39 = vld [vmem:[%s4756_s7 + $0x754] sm:$0xf]  ;;  %v4199_v23 = vld [vmem:[%s4756_s7 + $0x6a4] sm:$0xf] }
 0x120   : > { %2284 = vmatpush.bf16.msra.mxu3 %v3610_v43  ;;  %v3514_v43 = vor.u32 %v4149_v55, %v3511_v5  ;;  %v4205_v55 = vld [vmem:[%s4756_s7 + $0x6d4] sm:$0xf]  ;;  %v3863_v33 = vld [vmem:[%s4756_s7 + $0x7d8] sm:$0xf0] }
 0x121   : > { %2246 = vmatpush.bf16.msra.mxu0 %v3410_v45  ;;  %v2020_v22 = vpop.f32.mrf.mxu2  ;;  %v3503_v45 = vld [vmem:[%s4756_s7 + $0x508] sm:$0xf0]  ;;  %v4237_v27 = vld [vmem:[%s4756_s7 + $0x7d4] sm:$0xf]  ;;  %v1967_v21 = vadd.f32 %v5207_v44, %v1954_v49  ;;  %v3738_v58 = vor.u32 %v4205_v55, %v3735_v56  ;;  %v3639_v55 = vld [vmem:[%s4756_s7 + $0x618] sm:$0xf0] }
 0x122   : > { %2259 = vmatpush.bf16.msra.mxu1 %v3474_v63  ;;  %v4163_v63 = vld [vmem:[%s4756_s7 + $0x584] sm:$0xf]  ;;  %v2033_v1 = vpop.f32.mrf.mxu3  ;;  %v3866_v7 = vor.u32 %v4237_v27, %v3863_v33  ;;  %v3855_v44 = vld [vmem:[%s4756_s7 + $0x7c8] sm:$0xf0]  ;;  %v3767_v27 = vld [vmem:[%s4756_s7 + $0x718] sm:$0xf0] }
 0x123   : > { %2272 = vmatpush.bf16.msra.mxu2 %v3538_v0  ;;  %v3567_v0 = vld [vmem:[%s4756_s7 + $0x588] sm:$0xf0]  ;;  %v4229_v33 = vld [vmem:[%s4756_s7 + $0x794] sm:$0xf] }
 0x124   : > { %2285 = vmatpush.bf16.msra.mxu3 %v3602_v6  ;;  %v4209_v6 = vld [vmem:[%s4756_s7 + $0x6f4] sm:$0xf]  ;;  %v3570_v16 = vor.u32 %v4163_v63, %v3567_v0  ;;  %v1980_v0 = vadd.f32 %v5212_v50, %v1967_v21 }
 0x125   : > { %2247 = vmatpush.bf16.msra.mxu0 %v3402_v13  ;;  %v3506_v13 = vor.u32 %v4147_v60, %v3503_v45  ;;  %v3754_v18 = vor.u32 %v4209_v6, %v3751_v9  ;;  %v3791_v60 = vld [vmem:[%s4756_s7 + $0x748] sm:$0xf0]  ;;  %v3655_v6 = vld [vmem:[%s4756_s7 + $0x638] sm:$0xf0] }
 0x126   : > { %2260 = vmatpush.bf16.msra.mxu1 %v3466_v14  ;;  %v4241_v14 = vld [vmem:[%s4756_s7 + $0x7f4] sm:$0xf]  ;;  %v3658_v50 = vor.u32 %v4185_v3, %v3655_v6 }
 0x127   : > { %2273 = vmatpush.bf16.msra.mxu2 %v3530_v15  ;;  %v3879_v15 = vld [vmem:[%s4756_s7 + $0x7f8] sm:$0xf0] }
 0x128   : > { %2286 = vmatpush.bf16.msra.mxu3 %v3594_v20  ;;  %v3818_v20 = vor.u32 %v4225_v10, %v3815_v11  ;;  %v3882_v37 = vor.u32 %v4241_v14, %v3879_v15  ;;  %v3719_v10 = vld [vmem:[%s4756_s7 + $0x6b8] sm:$0xf0]  ;;  %v4217_v11 = vld [vmem:[%s4756_s7 + $0x734] sm:$0xf]  ;;  %v1993_v15 = vadd.f32 %v5260_v62, %v1980_v0  ;;  %v4231_v62 = vld [vmem:[%s4756_s7 + $0x7a4] sm:$0xf] }
 0x129   : > { %2248 = vmatpush.bf16.msra.mxu0 %v3394_v40  ;;  %v4223_v40 = vld [vmem:[%s4756_s7 + $0x764] sm:$0xf]  ;;  %v3847_v14 = vld [vmem:[%s4756_s7 + $0x7b8] sm:$0xf0] }
 0x12a   : > { %2261 = vmatpush.bf16.msra.mxu1 %v3458_v46  ;;  %v4239_v46 = vld [vmem:[%s4756_s7 + $0x7e4] sm:$0xf]  ;;  %v3810_v52 = vor.u32 %v4223_v40, %v3807_v41  ;;  %v3775_v40 = vld [vmem:[%s4756_s7 + $0x728] sm:$0xf0] }
 0x12b   : > { %2274 = vmatpush.bf16.msra.mxu2 %v3522_v47  ;;  %v3871_v47 = vld [vmem:[%s4756_s7 + $0x7e8] sm:$0xf0] }
 0x12c   : > { %2287 = vmatpush.bf16.msra.mxu3 %v3586_v53  ;;  %v4189_v53 = vld [vmem:[%s4756_s7 + $0x654] sm:$0xf]  ;;  %v3874_v5 = vor.u32 %v4239_v46, %v3871_v47  ;;  %v3839_v46 = vld [vmem:[%s4756_s7 + $0x7a8] sm:$0xf0] }
 0x12d   : > { %2249 = vmatpush.bf16.msra.mxu0 %v3386_v57  ;;  %v3799_v57 = vld [vmem:[%s4756_s7 + $0x758] sm:$0xf0]  ;;  %v3842_v56 = vor.u32 %v4231_v62, %v3839_v46 }
 0x12e   : > { %2262 = vmatpush.bf16.msra.mxu1 %v3450_v42  ;;  %v3802_v42 = vor.u32 %v4221_v39, %v3799_v57  ;;  %v3703_v39 = vld [vmem:[%s4756_s7 + $0x698] sm:$0xf0]  ;;  %v4213_v57 = vld [vmem:[%s4756_s7 + $0x714] sm:$0xf] }
 0x12f   : > { %2275 = vmatpush.bf16.msra.mxu2 %v3514_v43  ;;  %v3663_v43 = vld [vmem:[%s4756_s7 + $0x648] sm:$0xf0] }
 0x130   : > { %2288 = vmatpush.bf16.msra.mxu3 %v3578_v61  ;;  %v4235_v61 = vld [vmem:[%s4756_s7 + $0x7c4] sm:$0xf] }
 0x131   : > { %2250 = vmatpush.bf16.msra.mxu0 %v3378_v8  ;;  %v5337_v22 = vpop.f32.mrf.mxu0  ;;  %v4201_v8 = vld [vmem:[%s4756_s7 + $0x6b4] sm:$0xf]  ;;  %v3858_v9 = vor.u32 %v4235_v61, %v3855_v44  ;;  %v4227_v44 = vld [vmem:[%s4756_s7 + $0x784] sm:$0xf] }
 0x132   : > { %2263 = vmatpush.bf16.msra.mxu1 %v3442_v12  ;;  %v5341_v63 = vpop.f32.mrf.mxu1  ;;  %v3783_v12 = vld [vmem:[%s4756_s7 + $0x738] sm:$0xf0] }
 0x133   : > { %2276 = vmatpush.bf16.msra.mxu2 %v3506_v13  ;;  %v4233_v13 = vld [vmem:[%s4756_s7 + $0x7b4] sm:$0xf] }
 0x134   : > { %2289 = vmatpush.bf16.msra.mxu3 %v3570_v16  ;;  %2251 = vmatmul.bf16.vlgmr.msra.gmra.mxu0 %v5005_v26  ;;  %v3674_v26 = vor.u32 %v4189_v53, %v3671_v54  ;;  %v3722_v16 = vor.u32 %v4201_v8, %v3719_v10  ;;  %v3850_v25 = vor.u32 %v4233_v13, %v3847_v14  ;;  %v4181_v54 = vld [vmem:[%s4756_s7 + $0x614] sm:$0xf] }
 0x135   : > { %2295 = vmatpush.bf16.msrb.mxu0 %v3690_v17  ;;  %2264 = vmatmul.bf16.vlgmr.msra.gmra.mxu1 %v5012_v31  ;;  %v4203_v31 = vld [vmem:[%s4756_s7 + $0x6c4] sm:$0xf]  ;;  %v3786_v17 = vor.u32 %v4217_v11, %v3783_v12  ;;  %v3778_v53 = vor.u32 %v4215_v38, %v3775_v40 }
 0x136   : > { %2308 = vmatpush.bf16.msrb.mxu1 %v3754_v18  ;;  %2277 = vmatmul.bf16.vlgmr.msra.gmra.mxu2 %v5010_v30  ;;  %v4187_v30 = vld [vmem:[%s4756_s7 + $0x644] sm:$0xf]  ;;  %v3730_v1 = vor.u32 %v4203_v31, %v3727_v59  ;;  %v3695_v59 = vld [vmem:[%s4756_s7 + $0x688] sm:$0xf0] }
 0x137   : > { %2321 = vmatpush.bf16.msrb.mxu2 %v3818_v20  ;;  %2290 = vmatmul.bf16.vlgmr.msra.gmra.mxu3 %v5016_v34  ;;  %v4219_v34 = vld [vmem:[%s4756_s7 + $0x744] sm:$0xf]  ;;  %v3666_v45 = vor.u32 %v4187_v30, %v3663_v43  ;;  %v3647_v20 = vld [vmem:[%s4756_s7 + $0x628] sm:$0xf0] }
 0x138   : > { %2334 = vmatpush.bf16.msrb.mxu3 %v3882_v37  ;;  %v3794_v2 = vor.u32 %v4219_v34, %v3791_v60  ;;  %v4183_v18 = vld [vmem:[%s4756_s7 + $0x624] sm:$0xf]  ;;  %v3711_v37 = vld [vmem:[%s4756_s7 + $0x6a8] sm:$0xf0] }
 0x139   : > { %2296 = vmatpush.bf16.msrb.mxu0 %v3682_v48  ;;  %v5356_v28 = vpop.f32.mrf.mxu2  ;;  %v2046_v47 = vpop.f32.mrf.mxu0  ;;  %v3650_v48 = vor.u32 %v4183_v18, %v3647_v20  ;;  %v4179_v30 = vld [vmem:[%s4756_s7 + $0x604] sm:$0xf]  ;;  %v3631_v43 = vld [vmem:[%s4756_s7 + $0x608] sm:$0xf0] }
 0x13a   : > { %2309 = vmatpush.bf16.msrb.mxu1 %v3746_v51  ;;  %v2083_v41 = vpop.f32.mrf.mxu3  ;;  %v2059_v49 = vpop.f32.mrf.mxu1  ;;  %v2006_v51 = vadd.f32 %v5265_v4, %v1993_v15  ;;  %v3831_v4 = vld [vmem:[%s4756_s7 + $0x798] sm:$0xf0]  ;;  %v4195_v31 = vld [vmem:[%s4756_s7 + $0x684] sm:$0xf]  ;;  %v3759_v60 = vld [vmem:[%s4756_s7 + $0x708] sm:$0xf0] }
 0x13b   : > { %2322 = vmatpush.bf16.msrb.mxu2 %v3810_v52  ;;  %v3714_v52 = vor.u32 %v4199_v23, %v3711_v37  ;;  %v4211_v34 = vld [vmem:[%s4756_s7 + $0x704] sm:$0xf] }
 0x13c   : > { %2335 = vmatpush.bf16.msrb.mxu3 %v3874_v5  ;;  %v4197_v5 = vld [vmem:[%s4756_s7 + $0x694] sm:$0xf]  ;;  %v2019_v21 = vadd.f32 %v5275_v19, %v2006_v51  ;;  %v3762_v3 = vor.u32 %v4211_v34, %v3759_v60 }
 0x13d   : > { %2297 = vmatpush.bf16.msrb.mxu0 %v3674_v26  ;;  %v3642_v26 = vor.u32 %v4181_v54, %v3639_v55 }
 0x13e   : > { %2310 = vmatpush.bf16.msrb.mxu1 %v3738_v58  ;;  %v3706_v58 = vor.u32 %v4197_v5, %v3703_v39  ;;  %v2032_v19 = vadd.f32 %v5280_v35, %v2019_v21 }
 0x13f   : > { %2323 = vmatpush.bf16.msrb.mxu2 %v3802_v42  ;;  %v3770_v42 = vor.u32 %v4213_v57, %v3767_v27 }
 0x140   : > { %2336 = vmatpush.bf16.msrb.mxu3 %v3866_v7  ;;  %v3834_v7 = vor.u32 %v4229_v33, %v3831_v4  ;;  %v2045_v8 = vadd.f32 %v5337_v22, %v2032_v19 }
 0x141   : > { %2298 = vmatpush.bf16.msrb.mxu0 %v3666_v45  ;;  %v2072_v61 = vpop.f32.mrf.mxu2  ;;  %v3823_v45 = vld [vmem:[%s4756_s7 + $0x788] sm:$0xf0] }
 0x142   : > { %2311 = vmatpush.bf16.msrb.mxu1 %v3730_v1  ;;  %v2085_v0 = vpop.f32.mrf.mxu3  ;;  %v3634_v1 = vor.u32 %v4179_v30, %v3631_v43  ;;  %v3826_v6 = vor.u32 %v4227_v44, %v3823_v45 }
 0x143   : > { %2324 = vmatpush.bf16.msrb.mxu2 %v3794_v2  ;;  %v3698_v2 = vor.u32 %v4195_v31, %v3695_v59 }
 0x144   : > { %2337 = vmatpush.bf16.msrb.mxu3 %v3858_v9  ;;  %v2058_v9 = vadd.f32 %v5341_v63, %v2045_v8  ;;  %v329_v63 = vld [vmem:[#allocation2] sm:$0xff] }
 0x145   : > { %2299 = vmatpush.bf16.msrb.mxu0 %v3658_v50 }
 0x146   : > { %2312 = vmatpush.bf16.msrb.mxu1 %v3722_v16  ;;  %v2071_v35 = vadd.f32 %v5356_v28, %v2058_v9 }
 0x147   : > { %2325 = vmatpush.bf16.msrb.mxu2 %v3786_v17 }
 0x148   : > { %2338 = vmatpush.bf16.msrb.mxu3 %v3850_v25  ;;  %v2084_v10 = vadd.f32 %v2083_v41, %v2071_v35 }
 0x149   : > { %2300 = vmatpush.bf16.msrb.mxu0 %v3650_v48 }
 0x14a   : > { %2313 = vmatpush.bf16.msrb.mxu1 %v3714_v52 }
 0x14b   : > { %2326 = vmatpush.bf16.msrb.mxu2 %v3778_v53 }
 0x14c   : > { %2339 = vmatpush.bf16.msrb.mxu3 %v3842_v56 }
 0x14d   : > { %2301 = vmatpush.bf16.msrb.mxu0 %v3642_v26 }
 0x14e   : > { %2314 = vmatpush.bf16.msrb.mxu1 %v3706_v58 }
 0x14f   : > { %2327 = vmatpush.bf16.msrb.mxu2 %v3770_v42 }
 0x150   : > { %2340 = vmatpush.bf16.msrb.mxu3 %v3834_v7 }
 0x151   : > { %2302 = vmatpush.bf16.msrb.mxu0 %v3634_v1  ;;  %v2096_v11 = vpop.f32.mrf.mxu0 }
 0x152   : > { %2315 = vmatpush.bf16.msrb.mxu1 %v3698_v2  ;;  %v2109_v12 = vpop.f32.mrf.mxu1  ;;  %v2097_v22 = vadd.f32 %v2096_v11, %v2084_v10  ;;  %v330_v2 = vld [vmem:[#allocation2 + $0x8] sm:$0xff] }
 0x153   : > { %2328 = vmatpush.bf16.msrb.mxu2 %v3762_v3 }
 0x154   : > { %2341 = vmatpush.bf16.msrb.mxu3 %v3826_v6  ;;  %2303 = vmatmul.bf16.vlgmr.msrb.gmra.mxu0 %v5083_v24  ;;  %v2110_v13 = vadd.f32 %v2109_v12, %v2097_v22 }
 0x155   : > { %2316 = vmatmul.bf16.vlgmr.msrb.gmra.mxu1 %v5090_v32 }
 0x156   : > { %2329 = vmatmul.bf16.vlgmr.msrb.gmra.mxu2 %v5088_v29 }
 0x157   : > { %2342 = vmatmul.bf16.vlgmr.msrb.gmra.mxu3 %v5094_v36 }
 0x159   : > { %v2122_v14 = vpop.f32.mrf.mxu2  ;;  %v2098_v16 = vpop.f32.mrf.mxu0 }
 0x15a   : > { %v2123_v50 = vadd.f32 %v2122_v14, %v2110_v13  ;;  %v2135_v15 = vpop.f32.mrf.mxu3  ;;  %v2111_v17 = vpop.f32.mrf.mxu1 }
 0x15c   : > { %v2136_v24 = vadd.f32 %v2135_v15, %v2123_v50 }
 0x15e   : > { %v2347_v18 = vadd.f32 %v2136_v24, %v329_v63 }
 0x160   : > { %2349 = vst [vmem:[#allocation2] sm:$0xff] %v2347_v18 }
 0x161   : > { %v2124_v32 = vpop.f32.mrf.mxu2 }
 0x162   : > { %v2137_v29 = vpop.f32.mrf.mxu3 }
 0x171   : > { %v2148_v20 = vpop.f32.mrf.mxu0 }
 0x172   : > { %v2161_v23 = vpop.f32.mrf.mxu1 }
 0x173   : > { %v2162_v25 = vadd.f32 %v2161_v23, %v2148_v20 }
 0x179   : > { %v2174_v36 = vpop.f32.mrf.mxu2  ;;  %v2150_v40 = vpop.f32.mrf.mxu0 }
 0x17a   : > { %v2175_v28 = vadd.f32 %v2174_v36, %v2162_v25  ;;  %v2187_v37 = vpop.f32.mrf.mxu3  ;;  %v2163_v41 = vpop.f32.mrf.mxu1 }
 0x17c   : > { %v2188_v38 = vadd.f32 %v2187_v37, %v2175_v28 }
 0x181   : > { %v2176_v62 = vpop.f32.mrf.mxu2 }
 0x182   : > { %v2189_v46 = vpop.f32.mrf.mxu3 }
 0x191   : > { %v2200_v47 = vpop.f32.mrf.mxu0 }
 0x192   : > { %v2213_v48 = vpop.f32.mrf.mxu1  ;;  %v2201_v39 = vadd.f32 %v2200_v47, %v2188_v38 }
 0x194   : > { %v2214_v4 = vadd.f32 %v2213_v48, %v2201_v39 }
 0x199   : > { %v2226_v49 = vpop.f32.mrf.mxu2  ;;  %v2202_v52 = vpop.f32.mrf.mxu0 }
 0x19a   : > { %v2239_v51 = vpop.f32.mrf.mxu3  ;;  %v2215_v53 = vpop.f32.mrf.mxu1  ;;  %v2227_v21 = vadd.f32 %v2226_v49, %v2214_v4 }
 0x19c   : > { %v2240_v30 = vadd.f32 %v2239_v51, %v2227_v21 }
 0x1a1   : > { %v2228_v54 = vpop.f32.mrf.mxu2 }
 0x1a2   : > { %v2241_v55 = vpop.f32.mrf.mxu3 }
 0x1b1   : > { %v2252_v5 = vpop.f32.mrf.mxu0 }
 0x1b2   : > { %v2265_v56 = vpop.f32.mrf.mxu1  ;;  %v2253_v43 = vadd.f32 %v2252_v5, %v2240_v30 }
 0x1b4   : > { %v2266_v31 = vadd.f32 %v2265_v56, %v2253_v43 }
 0x1b9   : > { %v2278_v57 = vpop.f32.mrf.mxu2  ;;  %v2254_v33 = vpop.f32.mrf.mxu0 }
 0x1ba   : > { %v2291_v27 = vpop.f32.mrf.mxu3  ;;  %v2267_v26 = vpop.f32.mrf.mxu1  ;;  %v2279_v7 = vadd.f32 %v2278_v57, %v2266_v31 }
 0x1bc   : > { %v2292_v59 = vadd.f32 %v2291_v27, %v2279_v7 }
 0x1c1   : > { %v2280_v58 = vpop.f32.mrf.mxu2 }
 0x1c2   : > { %v2293_v42 = vpop.f32.mrf.mxu3 }
 0x1d1   : > { %v2304_v34 = vpop.f32.mrf.mxu0 }
 0x1d2   : > { %v2317_v60 = vpop.f32.mrf.mxu1  ;;  %v2305_v61 = vadd.f32 %v2304_v34, %v2292_v59 }
 0x1d4   : > { %v2318_v44 = vadd.f32 %v2317_v60, %v2305_v61 }
 0x1d9   : > { %v2330_v45 = vpop.f32.mrf.mxu2  ;;  %v2306_v19 = vpop.f32.mrf.mxu0 }
 0x1da   : > { %v2331_v0 = vadd.f32 %v2330_v45, %v2318_v44  ;;  %v2343_v1 = vpop.f32.mrf.mxu3  ;;  %v2319_v3 = vpop.f32.mrf.mxu1 }
 0x1dc   : > { %v2344_v6 = vadd.f32 %v2343_v1, %v2331_v0 }
 0x1de   : > { %v2348_v8 = vadd.f32 %v2344_v6, %v330_v2  ;;  %2354 = sbr.rel (%p3883_p1) target bundleno = 871 (0x367), region = 68 }
 0x1e0   : > { %2350 = vst [vmem:[#allocation2 + $0x8] sm:$0xff] %v2348_v8 }
 0x1e1   : > { %v2332_v9 = vpop.f32.mrf.mxu2 }
 0x1e2   : > { %v2345_v35 = vpop.f32.mrf.mxu3 }
 0x1e3   : > { %v4250_v10 = vld [vmem:[#allocation8 + $0x38] sm:$0xff]  ;;  %v4601_v12 = vmov 8.0   ;;  %v4249_v22 = vld [vmem:[#allocation8 + $0x30] sm:$0xff]  ;;  %v4248_v15 = vld [vmem:[#allocation8 + $0x28] sm:$0xff]  ;;  %vm2426_vm7 = vcmask 1040384  }
 0x1e4   : > { %v4258_v11 = vld [vmem:[#allocation8 + $0x78] sm:$0xff]  ;;  %4355 = vrcp.f32 %v4601_v12  ;;  %2586 = vmatpush.bf16.msra.mxu0 %v4250_v10  ;;  %v4257_v13 = vld [vmem:[#allocation8 + $0x70] sm:$0xff]  ;;  %v4256_v16 = vld [vmem:[#allocation8 + $0x68] sm:$0xff] }
 0x1e5   : > { %2599 = vmatpush.bf16.msra.mxu1 %v4258_v11  ;;  %v5390_v14 = vld [vmem:[#allocation2] sm:$0xff]  ;;  %v4247_v28 = vld [vmem:[#allocation8 + $0x20] sm:$0xff]  ;;  %v4246_v53 = vld [vmem:[#allocation8 + $0x18] sm:$0xff] }
 0x1e6   : > { %v2357_v63 = vrot.slane %v5390_v14, 4  ;;  %v2378_v24 = vmul.f32 %v5390_v14, %v5390_v14  ;;  %v4255_v37 = vld [vmem:[#allocation8 + $0x60] sm:$0xff]  ;;  %v4254_v54 = vld [vmem:[#allocation8 + $0x58] sm:$0xff]  ;;  %v4245_v58 = vld [vmem:[#allocation8 + $0x10] sm:$0xff] }
 0x1e7   : > { %v5392_v50 = vld [vmem:[#allocation2 + $0x8] sm:$0xff]  ;;  %v4253_v42 = vld [vmem:[#allocation8 + $0x50] sm:$0xff]  ;;  %v4244_v44 = vld [vmem:[#allocation8 + $0x8] sm:$0xff] }
 0x1e8   : > { %2587 = vmatpush.bf16.msra.mxu0 %v4249_v22  ;;  %v2363_v17 = vrot.slane %v5392_v50, 4  ;;  %v2379_v18 = vmul.f32 %v5392_v50, %v5392_v50  ;;  %v2358_v29 = vadd.f32 %v2357_v63, %v5390_v14  ;;  %v2380_v25 = vrot.slane %v2378_v24, 4  ;;  %v4252_v45 = vld [vmem:[#allocation8 + $0x48] sm:$0xff]  ;;  %v4243_v3 = vld [vmem:[#allocation8] sm:$0xff] }
 0x1e9   : > { %2600 = vmatpush.bf16.msra.mxu1 %v4257_v13  ;;  %v4251_v6 = vld [vmem:[#allocation8 + $0x40] sm:$0xff] }
 0x1ea   : > { %v4356_v32 = vpop.eup %4355  ;;  %v2364_v20 = vadd.f32 %v2363_v17, %v5392_v50  ;;  %v2386_v36 = vrot.slane %v2379_v18, 4  ;;  %v2359_v38 = vrot.slane %v2358_v29, 2  ;;  %v2381_v62 = vadd.f32 %v2380_v25, %v2378_v24 }
 0x1eb   : > { %v2370_v23 = vmul.f32 8.0, %v4356_v32  ;;  %vm2374_vm0 = vweird.f32 %v4356_v32 }
 0x1ec   : > { %2588 = vmatpush.bf16.msra.mxu0 %v4248_v15  ;;  %v2365_v40 = vrot.slane %v2364_v20, 2  ;;  %v2387_v46 = vadd.f32 %v2386_v36, %v2379_v18  ;;  %v2360_v47 = vadd.f32 %v2359_v38, %v2358_v29  ;;  %v2382_v51 = vrot.slane %v2381_v62, 2 }
 0x1ed   : > { %2601 = vmatpush.bf16.msra.mxu1 %v4256_v16  ;;  %v2371_v41 = vsub.f32 1.0, %v2370_v23 }
 0x1ee   : > { %v2366_v48 = vadd.f32 %v2365_v40, %v2364_v20  ;;  %v2388_v52 = vrot.slane %v2387_v46, 2  ;;  %v2361_v55 = vrot.slane %v2360_v47, 1  ;;  %v2383_v39 = vadd.f32 %v2382_v51, %v2381_v62  ;;  %v2400_v20 = vld [vmem:[#allocation11] ss:$8 sm:$0x3] }
 0x1ef   : > { %v2372_v49 = vmul.f32 %v4356_v32, %v2371_v41  ;;  %v2431_v41 = vld [vmem:[#allocation11 + $0x1] ss:$8 sm:$0x3] }
 0x1f0   : > { %2589 = vmatpush.bf16.msra.mxu0 %v4247_v28  ;;  %v2367_v5 = vrot.slane %v2366_v48, 1  ;;  %v2389_v57 = vadd.f32 %v2388_v52, %v2387_v46  ;;  %v2362_v27 = vadd.f32 %v2361_v55, %v2360_v47  ;;  %v2384_v26 = vrot.slane %v2383_v39, 1 }
 0x1f1   : > { %2602 = vmatpush.bf16.msra.mxu1 %v4255_v37  ;;  %v2373_v56 = vadd.f32 %v4356_v32, %v2372_v49 }
 0x1f2   : > { %v2368_v33 = vadd.f32 %v2367_v5, %v2366_v48  ;;  %v2390_v21 = vrot.slane %v2389_v57, 1  ;;  %v2385_v31 = vadd.f32 %v2384_v26, %v2383_v39  ;;  %v4263_v26 = vld [vmem:[#allocation9 + $0x20] sm:$0xff] }
 0x1f3   : > { %v5402_v4 = vsel %vm2374_vm0, %v4356_v32, %v2373_v56 }
 0x1f4   : > { %2590 = vmatpush.bf16.msra.mxu0 %v4246_v53  ;;  %v2376_v30 = vmul.f32 %v5402_v4, %v2362_v27  ;;  %v2377_v43 = vmul.f32 %v5402_v4, %v2368_v33  ;;  %v2391_v7 = vadd.f32 %v2390_v21, %v2389_v57  ;;  %v2392_v60 = vmul.f32 %v2385_v31, %v5402_v4  ;;  %v4266_v57 = vld [vmem:[#allocation9 + $0x38] sm:$0xff]  ;;  %v4265_v27 = vld [vmem:[#allocation9 + $0x30] sm:$0xff]  ;;  %v4264_v33 = vld [vmem:[#allocation9 + $0x28] sm:$0xff] }
 0x1f5   : > { %2603 = vmatpush.bf16.msra.mxu1 %v4254_v54  ;;  %2715 = vmatpush.bf16.msra.mxu2 %v4266_v57 }
 0x1f6   : > { %v2394_v59 = vmul.f32 %v2376_v30, %v2376_v30  ;;  %v2395_v34 = vmul.f32 %v2377_v43, %v2377_v43  ;;  %v2393_v61 = vmul.f32 %v2391_v7, %v5402_v4 }
 0x1f8   : > { %2591 = vmatpush.bf16.msra.mxu0 %v4245_v58  ;;  %v2396_v0 = vsub.f32 %v2392_v60, %v2394_v59  ;;  %v2397_v1 = vsub.f32 %v2393_v61, %v2395_v34  ;;  %v4260_v59 = vld [vmem:[#allocation9 + $0x8] sm:$0xff] }
 0x1f9   : > { %2604 = vmatpush.bf16.msra.mxu1 %v4253_v42  ;;  %2716 = vmatpush.bf16.msra.mxu2 %v4265_v27  ;;  %v4261_v42 = vld [vmem:[#allocation9 + $0x10] sm:$0xff] }
 0x1fa   : > { %v2398_v19 = vmax.f32 %v2396_v0, 0.0  ;;  %v2399_v2 = vmax.f32 %v2397_v1, 0.0  ;;  %v4259_v1 = vld [vmem:[#allocation9] sm:$0xff] }
 0x1fc   : > { %2592 = vmatpush.bf16.msra.mxu0 %v4244_v44  ;;  %v2401_v8 = vadd.f32 1e-05, %v2398_v19  ;;  %v2402_v9 = vadd.f32 1e-05, %v2399_v2 }
 0x1fd   : > { %2605 = vmatpush.bf16.msra.mxu1 %v4252_v45  ;;  %2717 = vmatpush.bf16.msra.mxu2 %v4264_v33 }
 0x1fe   : > { %4357 = vrsqrt.f32 %v2401_v8  ;;  %vm2409_vm1 = vweird.f32 %v2401_v8  ;;  %vm2419_vm3 = vweird.f32 %v2402_v9 }
 0x1ff   : > { %4359 = vrsqrt.f32 %v2402_v9 }
 0x200   : > { %2593 = vmatpush.bf16.msra.mxu0 %v4243_v3 }
 0x201   : > { %2606 = vmatpush.bf16.msra.mxu1 %v4251_v6  ;;  %2718 = vmatpush.bf16.msra.mxu2 %v4263_v26 }
 0x204   : > { %v4358_v35 = vpop.eup %4357 }
 0x205   : > { %v4360_v10 = vpop.eup %4359  ;;  %v2404_v11 = vmul.f32 %v4358_v35, %v2401_v8  ;;  %vm2410_vm2 = vweird.f32 %v4358_v35 }
 0x206   : > { %v2414_v12 = vmul.f32 %v4360_v10, %v2402_v9  ;;  %vm2420_vm4 = vweird.f32 %v4360_v10  ;;  %vm2411_vm5 = vmor %vm2409_vm1, %vm2410_vm2 }
 0x207   : > { %v2405_v22 = vmul.f32 %v4358_v35, %v2404_v11  ;;  %vm2421_vm6 = vmor %vm2419_vm3, %vm2420_vm4 }
 0x208   : > { %v2415_v13 = vmul.f32 %v4360_v10, %v2414_v12 }
 0x209   : > { %v2406_v15 = vmul.f32 0.5, %v2405_v22 }
 0x20a   : > { %v2416_v16 = vmul.f32 0.5, %v2415_v13 }
 0x20b   : > { %v2407_v63 = vsub.f32 1.5, %v2406_v15 }
 0x20c   : > { %v2417_v17 = vsub.f32 1.5, %v2416_v16 }
 0x20d   : > { %v2408_v24 = vmul.f32 %v4358_v35, %v2407_v63 }
 0x20e   : > { %v2418_v18 = vmul.f32 %v4360_v10, %v2417_v17 }
 0x20f   : > { %v2412_v32 = vsel %vm2411_vm5, %v4358_v35, %v2408_v24  ;;  %v2630_v24 = vld [vmem:[#allocation11 + $0x2] ss:$0 sm:$0xff] }
 0x210   : > { %v2422_v29 = vsel %vm2421_vm6, %v4360_v10, %v2418_v18 }
 0x211   : > { %v2425_v23 = vrot.slane %v2422_v29, 7 }
 0x213   : > { %v2427_v25 = vsel %vm2426_vm7, %v2412_v32, %v2425_v23 }
 0x214   : > { %v2429_v36 = vmul.f32 %v2427_v25, %v2400_v20  ;;  %v2643_v20 = vld [vmem:[#allocation11 + $0x3] ss:$0 sm:$0xff] }
 0x216   : > { %v2433_v28 = vperm.slane %v2429_v36, 0  ;;  %v2434_v37 = vperm.slane %v2429_v36, 1 }
 0x218   : > { %v2437_v38 = vmul.f32 %v2433_v28, %v2376_v30  ;;  %v2438_v40 = vmul.f32 %v2434_v37, %v2377_v43  ;;  %v2445_v48 = vmul.f32 %v2433_v28, %v5390_v14  ;;  %v2446_v49 = vmul.f32 %v2434_v37, %v5392_v50  ;;  %v4262_v14 = vld [vmem:[#allocation9 + $0x18] sm:$0xff] }
 0x219   : > { %2719 = vmatpush.bf16.msra.mxu2 %v4262_v14 }
 0x21a   : > { %v2441_v62 = vrot.slane %v2438_v40, 7 }
 0x21c   : > { %v2442_v46 = vsel %vm2426_vm7, %v2437_v38, %v2441_v62  ;;  %v2666_v38 = vld [vmem:[#allocation11 + $0x4] ss:$0 sm:$0xff] }
 0x21d   : > { %v2444_v47 = vsub.f32 %v2431_v41, %v2442_v46  ;;  %2720 = vmatpush.bf16.msra.mxu2 %v4261_v42 }
 0x21f   : > { %v2448_v51 = vperm.slane %v2444_v47, 0  ;;  %v2449_v52 = vperm.slane %v2444_v47, 1 }
 0x221   : > { %v2452_v53 = vadd.f32 %v2448_v51, %v2445_v48  ;;  %v2453_v54 = vadd.f32 %v2449_v52, %v2446_v49  ;;  %2721 = vmatpush.bf16.msra.mxu2 %v4260_v59 }
 0x223   : > { %v2454_v55 = vmax.f32 %v2452_v53, 0.0  ;;  %v2455_v5 = vmax.f32 %v2453_v54, 0.0 }
 0x225   : > { %v2456_v56 = vpack.c.bf16 %v2454_v55, %v2454_v55  ;;  %v2457_v39 = vpack.c.bf16 %v2455_v5, %v2455_v5  ;;  %2722 = vmatpush.bf16.msra.mxu2 %v4259_v1 }
 0x227   : > { %2594 = vmatmul.bf16.vlgmr.msra.gmra.mxu0 %v2456_v56  ;;  %2607 = vmatmul.bf16.vlgmr.msra.gmra.mxu1 %v2457_v39 }
 0x2a4   : > { %v2595_v50 = vpop.f32.mrf.mxu0  ;;  %v2608_v21 = vpop.f32.mrf.mxu1 }
 0x2a5   : > { %v2609_v58 = vadd.f32 %v2608_v21, %v2595_v50 }
 0x2a7   : > { %v2612_v30 = vrot.slane %v2609_v58, 4  ;;  %v2619_v43 = vmul.f32 %v2609_v58, %v2609_v58 }
 0x2a9   : > { %v2613_v31 = vadd.f32 %v2612_v30, %v2609_v58  ;;  %v2620_v7 = vrot.slane %v2619_v43, 4 }
 0x2ab   : > { %v2614_v34 = vrot.slane %v2613_v31, 2  ;;  %v2621_v60 = vadd.f32 %v2620_v7, %v2619_v43 }
 0x2ac   : > { %v2597_v61 = vpop.f32.mrf.mxu0  ;;  %v2610_v44 = vpop.f32.mrf.mxu1 }
 0x2ad   : > { %v2615_v45 = vadd.f32 %v2614_v34, %v2613_v31  ;;  %v2622_v0 = vrot.slane %v2621_v60, 2 }
 0x2af   : > { %v2623_v19 = vadd.f32 %v2622_v0, %v2621_v60  ;;  %v2616_v2 = vrot.slane %v2615_v45, 1 }
 0x2b1   : > { %v2624_v3 = vrot.slane %v2623_v19, 1  ;;  %v2617_v6 = vadd.f32 %v2616_v2, %v2615_v45 }
 0x2b3   : > { %v2625_v8 = vadd.f32 %v2624_v3, %v2623_v19  ;;  %v2618_v9 = vmul.f32 %v2617_v6, %v5402_v4 }
 0x2b5   : > { %v2626_v35 = vmul.f32 %v2625_v8, %v5402_v4  ;;  %v2627_v10 = vmul.f32 %v2618_v9, %v2618_v9 }
 0x2b7   : > { %v2628_v11 = vsub.f32 %v2626_v35, %v2627_v10 }
 0x2b9   : > { %v2629_v12 = vmax.f32 %v2628_v11, 0.0 }
 0x2bb   : > { %v2631_v22 = vadd.f32 1e-05, %v2629_v12 }
 0x2bd   : > { %4361 = vrsqrt.f32 %v2631_v22  ;;  %vm2638_vm9 = vweird.f32 %v2631_v22 }
 0x2c3   : > { %v4362_v13 = vpop.eup %4361 }
 0x2c4   : > { %v2633_v15 = vmul.f32 %v4362_v13, %v2631_v22  ;;  %vm2639_vm8 = vweird.f32 %v4362_v13 }
 0x2c5   : > { %vm2640_vm10 = vmor %vm2638_vm9, %vm2639_vm8 }
 0x2c6   : > { %v2634_v16 = vmul.f32 %v4362_v13, %v2633_v15 }
 0x2c8   : > { %v2635_v63 = vmul.f32 0.5, %v2634_v16 }
 0x2ca   : > { %v2636_v17 = vsub.f32 1.5, %v2635_v63 }
 0x2cc   : > { %v2637_v18 = vmul.f32 %v4362_v13, %v2636_v17 }
 0x2ce   : > { %v2641_v32 = vsel %vm2640_vm10, %v4362_v13, %v2637_v18 }
 0x2cf   : > { %v2642_v29 = vmul.f32 %v2641_v32, %v2630_v24 }
 0x2d1   : > { %v2644_v23 = vmul.f32 %v2642_v29, %v2618_v9  ;;  %v2646_v25 = vmul.f32 %v2642_v29, %v2609_v58 }
 0x2d3   : > { %v2645_v4 = vsub.f32 %v2643_v20, %v2644_v23 }
 0x2d5   : > { %v2647_v36 = vadd.f32 %v2646_v25, %v2645_v4 }
 0x2d7   : > { %v2648_v28 = vmax.f32 %v2647_v36, 0.0 }
 0x2d9   : > { %v2649_v37 = vpack.c.bf16 %v2648_v28, %v2648_v28 }
 0x2db   : > { %2723 = vmatmul.bf16.vlgmr.msra.gmra.mxu2 %v2649_v37 }
 0x35e   : > { %v2724_v40 = vpop.f32.mrf.mxu2 }
 0x35f   : > { %v2725_v41 = vadd.f32 %v2724_v40, %v2666_v38 }
 0x361   : > { %2728 = vst [vmem:[#allocation12] sm:$0xff] %v2725_v41 }
 0x366   : > { %v2726_v62 = vpop.f32.mrf.mxu2 }
 0x367 PF: > { %p4311_p3 = scmp.eq.s32.totalorder %s4657_s25, 1  ;;  %s4602_s26 = smov [#allocation12]  }
 0x368   : > { %s2735_s27 = sshll.u32 %s4602_s26, 4  ;;  %s2737_s16 = sshll.u32 %s5434_s5, 4  ;;  %s2736_s27 = int_to_ptr.vmem [resolvable:$true] %s2735_s27  ;;  %s2738_s16 = int_to_ptr.hbm [resolvable:$true] %s2737_s16 }
 0x369   : > { %4284 = dma.vmem_to_hbm [thread:$0]  (%p4311_p3), %s2736_s27, 128, %s2738_s16, [#allocation5]  }
 0x36a   : > { %4574 = dma.done.wait (%p4311_p3), [#allocation5], 128  }
 0x36b   : > { %4576 = vsyncadd (%p4311_p3), [#allocation5], 4294967168 }
 0x36c PF: > { %p20_p4 = scmp.ge.s32.totalorder %s4688_s17, 4   ;;  %s5441_s18 = smov %s4583_s19 }
 0x36d   : > { %s5442_s19 = smov %s4587_s20  ;;  %s5443_s20 = smov %s4699_s24 }
 0x36e   : > { %s5444_s21 = smov %s4688_s17  ;;  %22 = sbr.rel (!%p20_p4) target bundleno = 9 (0x9), region = 111 }
 0x373   :  { %2751 = vsyncpa [#allocation4], 1 }
 0x374   :  { %2753 = vsyncpa [#allocation4 + $0x1], 1 }
 0x375   :  { %2754 = vsyncpa [#allocation7], 1 }
 0x376   :  { %2756 = vsyncpa [#allocation7 + $0x1], 1 }
 0x377   :  { %2757 = vsyncpa [#allocation10], 1 }
 0x378   :  { %2758 = vsyncpa [#allocation5], 1 }
 0x379   :  { %2760 = vsyncpa [#allocation5 + $0x1], 1 }

</bundles_post_ra>
